<compile_context>
chip_gen: v5e
topology: v5e:2x2
jax: 0.10.0
libtpu: 0.0.40
codegen_flags: <defaults>
</compile_context>

<pallas_src>
import functools

import jax
import jax.numpy as jnp
from jax.experimental import pallas as pl
from jax.experimental.pallas import tpu as pltpu

EPS = 1e-5


# ----------------------------------------------------------------------------
# Fused Pallas kernel: conv3x3 + GN + SiLU -> conv3x3 + GN + SiLU -> conv1x1.
# One batch sample per grid step, channel-major (rows = channels, lanes = H*W).
# ----------------------------------------------------------------------------
def _fused_kernel(width, hw, c_in,
                  x_ref, ml_ref, mr_ref, amat_ref,
                  wa_ref, ba_ref, ga_ref, bta_ref,
                  wb_ref, bb_ref, gb_ref, btb_ref,
                  w1_ref, b1_ref,
                  o_ref,
                  xpad_ref, rhs_ref):
    pad = width + 1                       # H-pad row + 1 scalar pad on each side

    # Re-zero only the pad lanes of the persistent padded scratch every step
    # (2 x (C, W+1) stores, negligible).  Not gated on program_id==0 so it stays
    # correct when the batch grid axis is split across TensorCores (v7x megacore),
    # where each core owns a private scratch and may never see step 0.
    zpad = jnp.zeros((c_in, pad), xpad_ref.dtype)
    xpad_ref[:, :pad] = zpad
    xpad_ref[:, pad + hw:] = zpad

    mask_l = ml_ref[...]                  # (1, HW) bf16: 0 where col == 0     (kx==0 taps)
    mask_r = mr_ref[...]                  # (1, HW) bf16: 0 where col == W - 1 (kx==2 taps)
    amat = amat_ref[...]                  # (C, C)  f32 group-averaging matrix (1/(gs*HW))

    def conv3x3(w_ref, bias):
        # Build the stacked-K RHS (9*C_in, HW) bf16 once, then a single MXU
        # contraction: (C_out, 9*C_in) @ (9*C_in, HW) with f32 accumulation.
        for ky in range(3):
            for kx in range(3):
                off = ky * width + kx
                tap = xpad_ref[:, off:off + hw]          # (C_in, HW) bf16 lane slice
                if kx == 0:
                    tap = tap * mask_l
                elif kx == 2:
                    tap = tap * mask_r
                t = ky * 3 + kx
                rhs_ref[t * c_in:(t + 1) * c_in, :] = tap
        y = jnp.dot(w_ref[...], rhs_ref[...],
                    preferred_element_type=jnp.float32)
        return y + bias                                   # (C_out, HW) f32

    def groupnorm_silu(y, gamma, beta):
        # y: (C, HW) f32 ; gamma/beta: (C, 1) f32.  Single-pass E[x^2]-mu^2 stats
        # (fine at these magnitudes; switch to centered two-pass if activations
        # develop a large mean relative to their std).
        row_sum = jnp.sum(y, axis=1, keepdims=True)       # (C, 1)
        row_sq = jnp.sum(y * y, axis=1, keepdims=True)    # (C, 1)
        stats = jnp.concatenate([row_sum, row_sq], axis=1)          # (C, 2)
        g = jnp.dot(amat, stats, preferred_element_type=jnp.float32)
        mu = g[:, 0:1]
        var = g[:, 1:2] - mu * mu
        inv = jax.lax.rsqrt(var + EPS)
        yn = (y - mu) * (inv * gamma) + beta
        return yn * jax.nn.sigmoid(yn)                    # SiLU, f32

    # --- pre_integration: conv3x3 -> GN -> SiLU ---------------------------------
    xpad_ref[:, pad:pad + hw] = x_ref[0].astype(xpad_ref.dtype)   # cast to bf16 once
    y1 = conv3x3(wa_ref, ba_ref[...])
    a1 = groupnorm_silu(y1, ga_ref[...], bta_ref[...])

    # --- [toroidal / singularity / base model / refinement] = identity ----------
    # --- post_integration: conv3x3 -> GN -> SiLU -> conv1x1 ---------------------
    xpad_ref[:, pad:pad + hw] = a1.astype(xpad_ref.dtype)         # reuse padded scratch
    y2 = conv3x3(wb_ref, bb_ref[...])
    a2 = groupnorm_silu(y2, gb_ref[...], btb_ref[...])
    z = jnp.dot(w1_ref[...], a2.astype(jnp.bfloat16),
                preferred_element_type=jnp.float32) + b1_ref[...]
    o_ref[0] = z.astype(o_ref.dtype)


# ----------------------------------------------------------------------------
# Wrapper: ToroidalDiffusionModel.forward(return_dict=False), Pallas-backed.
# ----------------------------------------------------------------------------
def toroidal_diffusion_forward(sample, timestep, params):
    del timestep  # consumed only by the external base_model (identity here)
    x = sample
    B, C, H, W = x.shape
    HW = H * W
    Lp = (H + 2) * W + 2
    C_out = params["post_w1"].shape[0]
    G = params["num_groups"]
    gs = C // G

    # Free reshape; H/scalar padding now happens inside the kernel (no extra HBM
    # round trip for a padded activation copy).
    x_flat = x.reshape(B, C, HW)

    # Horizontal "SAME" boundary masks as {0,1} bf16 rows (exact).
    col = jnp.arange(HW, dtype=jnp.int32) % W
    mask_l = (col != 0).astype(jnp.bfloat16)[None, :]             # (1, HW)
    mask_r = (col != W - 1).astype(jnp.bfloat16)[None, :]         # (1, HW)

    # Group-averaging matrix: (amat @ per-channel sums) -> per-channel group mean.
    gidx = jnp.arange(C) // gs
    amat = (gidx[:, None] == gidx[None, :]).astype(jnp.float32) / float(gs * HW)

    def stacked_taps(w3):
        # (O, I, 3, 3) -> (O, 9*I) bf16, column index = (ky*3 + kx)*I + i.
        O, I = w3.shape[0], w3.shape[1]
        return w3.transpose(0, 2, 3, 1).reshape(O, 9 * I).astype(jnp.bfloat16)

    wa = stacked_taps(params["pre_w3"])
    wb = stacked_taps(params["post_w3"])
    w1 = params["post_w1"][:, :, 0, 0].astype(jnp.bfloat16)       # (C_out, C)

    def colv(v):                                                  # (C,) -> (C, 1) f32
        return v.astype(jnp.float32)[:, None]

    # VMEM limit: ~3/4 of physical (=> ~48 MiB on v7x, ~96 MiB on v5e/v6e).
    try:
        cap = int(pltpu.get_tpu_info().vmem_capacity_bytes)
        vmem_limit = int(min((cap * 3) // 4, 112 * 1024 * 1024))
    except Exception:
        vmem_limit = 48 * 1024 * 1024

    def const_spec(shape):
        # Constant-index-map operands: single-buffer them (double-buffering would
        # only duplicate weights/masks in VMEM).
        index = lambda b, n=len(shape): (0,) * n
        try:
            return pl.BlockSpec(shape, index, pipeline_mode=pl.Buffered(1))
        except Exception:  # older jax without pipeline_mode on BlockSpec
            return pl.BlockSpec(shape, index)

    out = pl.pallas_call(
        functools.partial(_fused_kernel, W, HW, C),
        out_shape=jax.ShapeDtypeStruct((B, C_out, HW), jnp.float32),
        grid=(B,),
        in_specs=[
            pl.BlockSpec((1, C, HW), lambda b: (b, 0, 0)),        # raw input sample
            const_spec((1, HW)),                                  # mask_l
            const_spec((1, HW)),                                  # mask_r
            const_spec((C, C)),                                   # group-avg matrix
            const_spec((C, 9 * C)),                               # pre conv3x3 stacked taps
            const_spec((C, 1)),                                   # pre bias
            const_spec((C, 1)),                                   # pre gamma
            const_spec((C, 1)),                                   # pre beta
            const_spec((C, 9 * C)),                               # post conv3x3 stacked taps
            const_spec((C, 1)),                                   # post bias
            const_spec((C, 1)),                                   # post gamma
            const_spec((C, 1)),                                   # post beta
            const_spec((C_out, C)),                               # 1x1 conv weight
            const_spec((C_out, 1)),                               # 1x1 conv bias
        ],
        out_specs=pl.BlockSpec((1, C_out, HW), lambda b: (b, 0, 0)),
        scratch_shapes=[
            pltpu.VMEM((C, Lp), jnp.bfloat16),                    # persistent padded act
            pltpu.VMEM((9 * C, HW), jnp.bfloat16),                # stacked-K conv RHS
        ],
        compiler_params=pltpu.CompilerParams(
            # NOTE: for B=1 sampling on v7x, add a second parallel axis (e.g. HW
            # tiles) so both TensorCores have work.
            dimension_semantics=("parallel",),
            vmem_limit_bytes=vmem_limit),
    )(x_flat, mask_l, mask_r, amat,
      wa, colv(params["pre_b3"]), colv(params["pre_gamma"]), colv(params["pre_beta"]),
      wb, colv(params["post_b3"]), colv(params["post_gamma"]), colv(params["post_beta"]),
      w1, colv(params["post_b1"]))

    # Channel-major output is already NCHW up to a pure (free) reshape.
    return out.reshape(B, C_out, H, W)


# ----------------------------------------------------------------------------
# Pure-JAX f32 reference (correctness check of the Pallas path).
# ----------------------------------------------------------------------------
def _ref_conv3x3(x, w, b):
    y = jax.lax.conv_general_dilated(
        x, w, window_strides=(1, 1), padding="SAME",
        dimension_numbers=("NCHW", "OIHW", "NCHW"))
    return y + b[None, :, None, None]


def _ref_groupnorm(x, G, gamma, beta):
    B, C, H, W = x.shape
    xg = x.reshape(B, G, C // G, H, W)
    mu = xg.mean(axis=(2, 3, 4), keepdims=True)
    var = ((xg - mu) ** 2).mean(axis=(2, 3, 4), keepdims=True)
    xn = ((xg - mu) * jax.lax.rsqrt(var + EPS)).reshape(B, C, H, W)
    return xn * gamma[None, :, None, None] + beta[None, :, None, None]


def _ref_forward(sample, params):
    G = params["num_groups"]
    x = _ref_conv3x3(sample, params["pre_w3"], params["pre_b3"])
    x = _ref_groupnorm(x, G, params["pre_gamma"], params["pre_beta"])
    x = x * jax.nn.sigmoid(x)
    # identity middle section (see TODO at top)
    y = _ref_conv3x3(x, params["post_w3"], params["post_b3"])
    y = _ref_groupnorm(y, G, params["post_gamma"], params["post_beta"])
    y = y * jax.nn.sigmoid(y)
    y = jnp.einsum("oc,bchw->bohw", params["post_w1"][:, :, 0, 0], y)
    return y + params["post_b1"][None, :, None, None]


# ----------------------------------------------------------------------------
if __name__ == "__main__":
    B, C, H, W = 2, 4, 16, 16          # in_channels = out_channels = 4
    C_out = C
    num_groups = (min(32, C) if C >= 32 else (min(8, C) if C >= 8 else 1))  # -> 1

    key = jax.random.PRNGKey(0)
    ks = jax.random.split(key, 8)
    sample = jax.random.normal(ks[0], (B, C, H, W), dtype=jnp.float32)
    timestep = jnp.array(10, dtype=jnp.int32)

    params = {
        "num_groups": num_groups,
        # pre_integration: Conv2d(C, C, 3, padding=1), GroupNorm(G, C), SiLU
        "pre_w3": 0.1 * jax.random.normal(ks[1], (C, C, 3, 3), jnp.float32),
        "pre_b3": 0.05 * jax.random.normal(ks[2], (C,), jnp.float32),
        "pre_gamma": jnp.ones((C,), jnp.float32),
        "pre_beta": jnp.zeros((C,), jnp.float32),
        # post_integration: Conv2d(C, C, 3, padding=1), GroupNorm(G, C), SiLU, Conv2d(C, C_out, 1)
        "post_w3": 0.1 * jax.random.normal(ks[3], (C, C, 3, 3), jnp.float32),
        "post_b3": 0.05 * jax.random.normal(ks[4], (C,), jnp.float32),
        "post_gamma": jnp.ones((C,), jnp.float32),
        "post_beta": jnp.zeros((C,), jnp.float32),
        "post_w1": 0.1 * jax.random.normal(ks[5], (C_out, C, 1, 1), jnp.float32),
        "post_b1": 0.05 * jax.random.normal(ks[6], (C_out,), jnp.float32),
    }

    out = toroidal_diffusion_forward(sample, timestep, params)
    out = jax.block_until_ready(out)
    assert out.shape == (B, C_out, H, W), out.shape

    ref = jax.block_until_ready(_ref_forward(sample, params))
    # Tolerance accounts for bf16 MXU operands (f32 accumulation); structural bugs
    # would produce errors far above this.
    max_err = float(jnp.max(jnp.abs(out - ref)))
    assert jnp.allclose(out, ref, rtol=5e-2, atol=5e-2), max_err

    print("KERNEL_OK")
</pallas_src>

<mosaic_0001>
module attributes {stable_mosaic.version = 11 : i64} {
  func.func @_fused_kernel(%arg0: i32, %arg1: memref<1x4x256xf32, #tpu.memory_space<vmem>>, %arg2: memref<1x256xbf16, #tpu.memory_space<vmem>>, %arg3: memref<1x256xbf16, #tpu.memory_space<vmem>>, %arg4: memref<4x4xf32, #tpu.memory_space<vmem>>, %arg5: memref<4x36xbf16, #tpu.memory_space<vmem>>, %arg6: memref<4x1xf32, #tpu.memory_space<vmem>>, %arg7: memref<4x1xf32, #tpu.memory_space<vmem>>, %arg8: memref<4x1xf32, #tpu.memory_space<vmem>>, %arg9: memref<4x36xbf16, #tpu.memory_space<vmem>>, %arg10: memref<4x1xf32, #tpu.memory_space<vmem>>, %arg11: memref<4x1xf32, #tpu.memory_space<vmem>>, %arg12: memref<4x1xf32, #tpu.memory_space<vmem>>, %arg13: memref<4x4xbf16, #tpu.memory_space<vmem>>, %arg14: memref<4x1xf32, #tpu.memory_space<vmem>>, %arg15: memref<1x4x256xf32, #tpu.memory_space<vmem>>, %arg16: memref<4x290xbf16, #tpu.memory_space<vmem>>, %arg17: memref<36x256xbf16, #tpu.memory_space<vmem>>) attributes {dimension_semantics = [#tpu.dimension_semantics<parallel>], iteration_bounds = array<i64: 2>, scalar_prefetch = 0 : i64, scratch_operands = 2 : i64, tpu.core_type = #tpu.core_type<tc>, window_params = [{transform_indices = @transform_0, window_bounds = array<i64: 1, 4, 256>}, {pipeline_mode = #tpu.pipeline_mode<synchronous>, transform_indices = @transform_1, window_bounds = array<i64: 1, 256>}, {pipeline_mode = #tpu.pipeline_mode<synchronous>, transform_indices = @transform_2, window_bounds = array<i64: 1, 256>}, {pipeline_mode = #tpu.pipeline_mode<synchronous>, transform_indices = @transform_3, window_bounds = array<i64: 4, 4>}, {pipeline_mode = #tpu.pipeline_mode<synchronous>, transform_indices = @transform_4, window_bounds = array<i64: 4, 36>}, {pipeline_mode = #tpu.pipeline_mode<synchronous>, transform_indices = @transform_5, window_bounds = array<i64: 4, 1>}, {pipeline_mode = #tpu.pipeline_mode<synchronous>, transform_indices = @transform_6, window_bounds = array<i64: 4, 1>}, {pipeline_mode = #tpu.pipeline_mode<synchronous>, transform_indices = @transform_7, window_bounds = array<i64: 4, 1>}, {pipeline_mode = #tpu.pipeline_mode<synchronous>, transform_indices = @transform_8, window_bounds = array<i64: 4, 36>}, {pipeline_mode = #tpu.pipeline_mode<synchronous>, transform_indices = @transform_9, window_bounds = array<i64: 4, 1>}, {pipeline_mode = #tpu.pipeline_mode<synchronous>, transform_indices = @transform_10, window_bounds = array<i64: 4, 1>}, {pipeline_mode = #tpu.pipeline_mode<synchronous>, transform_indices = @transform_11, window_bounds = array<i64: 4, 1>}, {pipeline_mode = #tpu.pipeline_mode<synchronous>, transform_indices = @transform_12, window_bounds = array<i64: 4, 4>}, {pipeline_mode = #tpu.pipeline_mode<synchronous>, transform_indices = @transform_13, window_bounds = array<i64: 4, 1>}, {transform_indices = @transform_14, window_bounds = array<i64: 1, 4, 256>}]} {
    %cst = arith.constant 0.000000e+00 : bf16
    %0 = vector.broadcast %cst : bf16 to vector<4x17xbf16>
    %c0 = arith.constant 0 : index
    %c0_0 = arith.constant 0 : index
    %1 = vector.load %arg16[%c0, %c0_0] : memref<4x290xbf16, #tpu.memory_space<vmem>>, vector<4x17xbf16>
    tpu.vector_store %arg16[%c0, %c0_0], %0 {strides = array<i32>} : memref<4x290xbf16, #tpu.memory_space<vmem>>, vector<4x17xbf16>,
    %c0_1 = arith.constant 0 : index
    %c273 = arith.constant 273 : index
    %2 = vector.load %arg16[%c0_1, %c273] : memref<4x290xbf16, #tpu.memory_space<vmem>>, vector<4x17xbf16>
    tpu.vector_store %arg16[%c0_1, %c273], %0 {strides = array<i32>} : memref<4x290xbf16, #tpu.memory_space<vmem>>, vector<4x17xbf16>,
    %c0_2 = arith.constant 0 : index
    %c0_3 = arith.constant 0 : index
    %3 = vector.load %arg2[%c0_2, %c0_3] : memref<1x256xbf16, #tpu.memory_space<vmem>>, vector<1x256xbf16>
    %c0_4 = arith.constant 0 : index
    %c0_5 = arith.constant 0 : index
    %4 = vector.load %arg3[%c0_4, %c0_5] : memref<1x256xbf16, #tpu.memory_space<vmem>>, vector<1x256xbf16>
    %c0_6 = arith.constant 0 : index
    %c0_7 = arith.constant 0 : index
    %5 = vector.load %arg4[%c0_6, %c0_7] : memref<4x4xf32, #tpu.memory_space<vmem>>, vector<4x4xf32>
    %c0_8 = arith.constant 0 : index
    %c0_9 = arith.constant 0 : index
    %c0_10 = arith.constant 0 : index
    %6 = vector.load %arg1[%c0_8, %c0_9, %c0_10] : memref<1x4x256xf32, #tpu.memory_space<vmem>>, vector<1x4x256xf32>
    %7 = vector.shape_cast %6 : vector<1x4x256xf32> to vector<4x256xf32>
    %8 = arith.truncf %7 : vector<4x256xf32> to vector<4x256xbf16>
    %c0_11 = arith.constant 0 : index
    %c17 = arith.constant 17 : index
    %9 = vector.load %arg16[%c0_11, %c17] : memref<4x290xbf16, #tpu.memory_space<vmem>>, vector<4x256xbf16>
    tpu.vector_store %arg16[%c0_11, %c17], %8 {strides = array<i32>} : memref<4x290xbf16, #tpu.memory_space<vmem>>, vector<4x256xbf16>,
    %c0_12 = arith.constant 0 : index
    %c0_13 = arith.constant 0 : index
    %10 = vector.load %arg6[%c0_12, %c0_13] : memref<4x1xf32, #tpu.memory_space<vmem>>, vector<4x1xf32>
    %c0_14 = arith.constant 0 : index
    %c0_15 = arith.constant 0 : index
    %11 = vector.load %arg16[%c0_14, %c0_15] : memref<4x290xbf16, #tpu.memory_space<vmem>>, vector<4x256xbf16>
    %12 = vector.broadcast %3 : vector<1x256xbf16> to vector<4x256xbf16>
    %13 = arith.mulf %11, %12 : vector<4x256xbf16>
    %c0_16 = arith.constant 0 : index
    %c0_17 = arith.constant 0 : index
    %14 = vector.load %arg17[%c0_16, %c0_17] : memref<36x256xbf16, #tpu.memory_space<vmem>>, vector<4x256xbf16>
    tpu.vector_store %arg17[%c0_16, %c0_17], %13 {strides = array<i32>} : memref<36x256xbf16, #tpu.memory_space<vmem>>, vector<4x256xbf16>,
    %c0_18 = arith.constant 0 : index
    %c1 = arith.constant 1 : index
    %15 = vector.load %arg16[%c0_18, %c1] : memref<4x290xbf16, #tpu.memory_space<vmem>>, vector<4x256xbf16>
    %c4 = arith.constant 4 : index
    %c0_19 = arith.constant 0 : index
    %16 = vector.load %arg17[%c4, %c0_19] : memref<36x256xbf16, #tpu.memory_space<vmem>>, vector<4x256xbf16>
    tpu.vector_store %arg17[%c4, %c0_19], %15 {strides = array<i32>} : memref<36x256xbf16, #tpu.memory_space<vmem>>, vector<4x256xbf16>,
    %c0_20 = arith.constant 0 : index
    %c2 = arith.constant 2 : index
    %17 = vector.load %arg16[%c0_20, %c2] : memref<4x290xbf16, #tpu.memory_space<vmem>>, vector<4x256xbf16>
    %18 = vector.broadcast %4 : vector<1x256xbf16> to vector<4x256xbf16>
    %19 = arith.mulf %17, %18 : vector<4x256xbf16>
    %c8 = arith.constant 8 : index
    %c0_21 = arith.constant 0 : index
    %20 = vector.load %arg17[%c8, %c0_21] : memref<36x256xbf16, #tpu.memory_space<vmem>>, vector<4x256xbf16>
    tpu.vector_store %arg17[%c8, %c0_21], %19 {strides = array<i32>} : memref<36x256xbf16, #tpu.memory_space<vmem>>, vector<4x256xbf16>,
    %c0_22 = arith.constant 0 : index
    %c16 = arith.constant 16 : index
    %21 = vector.load %arg16[%c0_22, %c16] : memref<4x290xbf16, #tpu.memory_space<vmem>>, vector<4x256xbf16>
    %22 = vector.broadcast %3 : vector<1x256xbf16> to vector<4x256xbf16>
    %23 = arith.mulf %21, %22 : vector<4x256xbf16>
    %c12 = arith.constant 12 : index
    %c0_23 = arith.constant 0 : index
    %24 = vector.load %arg17[%c12, %c0_23] : memref<36x256xbf16, #tpu.memory_space<vmem>>, vector<4x256xbf16>
    tpu.vector_store %arg17[%c12, %c0_23], %23 {strides = array<i32>} : memref<36x256xbf16, #tpu.memory_space<vmem>>, vector<4x256xbf16>,
    %c0_24 = arith.constant 0 : index
    %c17_25 = arith.constant 17 : index
    %25 = vector.load %arg16[%c0_24, %c17_25] : memref<4x290xbf16, #tpu.memory_space<vmem>>, vector<4x256xbf16>
    %c16_26 = arith.constant 16 : index
    %c0_27 = arith.constant 0 : index
    %26 = vector.load %arg17[%c16_26, %c0_27] : memref<36x256xbf16, #tpu.memory_space<vmem>>, vector<4x256xbf16>
    tpu.vector_store %arg17[%c16_26, %c0_27], %25 {strides = array<i32>} : memref<36x256xbf16, #tpu.memory_space<vmem>>, vector<4x256xbf16>,
    %c0_28 = arith.constant 0 : index
    %c18 = arith.constant 18 : index
    %27 = vector.load %arg16[%c0_28, %c18] : memref<4x290xbf16, #tpu.memory_space<vmem>>, vector<4x256xbf16>
    %28 = vector.broadcast %4 : vector<1x256xbf16> to vector<4x256xbf16>
    %29 = arith.mulf %27, %28 : vector<4x256xbf16>
    %c20 = arith.constant 20 : index
    %c0_29 = arith.constant 0 : index
    %30 = vector.load %arg17[%c20, %c0_29] : memref<36x256xbf16, #tpu.memory_space<vmem>>, vector<4x256xbf16>
    tpu.vector_store %arg17[%c20, %c0_29], %29 {strides = array<i32>} : memref<36x256xbf16, #tpu.memory_space<vmem>>, vector<4x256xbf16>,
    %c0_30 = arith.constant 0 : index
    %c32 = arith.constant 32 : index
    %31 = vector.load %arg16[%c0_30, %c32] : memref<4x290xbf16, #tpu.memory_space<vmem>>, vector<4x256xbf16>
    %32 = vector.broadcast %3 : vector<1x256xbf16> to vector<4x256xbf16>
    %33 = arith.mulf %31, %32 : vector<4x256xbf16>
    %c24 = arith.constant 24 : index
    %c0_31 = arith.constant 0 : index
    %34 = vector.load %arg17[%c24, %c0_31] : memref<36x256xbf16, #tpu.memory_space<vmem>>, vector<4x256xbf16>
    tpu.vector_store %arg17[%c24, %c0_31], %33 {strides = array<i32>} : memref<36x256xbf16, #tpu.memory_space<vmem>>, vector<4x256xbf16>,
    %c0_32 = arith.constant 0 : index
    %c33 = arith.constant 33 : index
    %35 = vector.load %arg16[%c0_32, %c33] : memref<4x290xbf16, #tpu.memory_space<vmem>>, vector<4x256xbf16>
    %c28 = arith.constant 28 : index
    %c0_33 = arith.constant 0 : index
    %36 = vector.load %arg17[%c28, %c0_33] : memref<36x256xbf16, #tpu.memory_space<vmem>>, vector<4x256xbf16>
    tpu.vector_store %arg17[%c28, %c0_33], %35 {strides = array<i32>} : memref<36x256xbf16, #tpu.memory_space<vmem>>, vector<4x256xbf16>,
    %c0_34 = arith.constant 0 : index
    %c34 = arith.constant 34 : index
    %37 = vector.load %arg16[%c0_34, %c34] : memref<4x290xbf16, #tpu.memory_space<vmem>>, vector<4x256xbf16>
    %38 = vector.broadcast %4 : vector<1x256xbf16> to vector<4x256xbf16>
    %39 = arith.mulf %37, %38 : vector<4x256xbf16>
    %c32_35 = arith.constant 32 : index
    %c0_36 = arith.constant 0 : index
    %40 = vector.load %arg17[%c32_35, %c0_36] : memref<36x256xbf16, #tpu.memory_space<vmem>>, vector<4x256xbf16>
    tpu.vector_store %arg17[%c32_35, %c0_36], %39 {strides = array<i32>} : memref<36x256xbf16, #tpu.memory_space<vmem>>, vector<4x256xbf16>,
    %c0_37 = arith.constant 0 : index
    %c0_38 = arith.constant 0 : index
    %41 = vector.load %arg5[%c0_37, %c0_38] : memref<4x36xbf16, #tpu.memory_space<vmem>>, vector<4x36xbf16>
    %c0_39 = arith.constant 0 : index
    %c0_40 = arith.constant 0 : index
    %42 = vector.load %arg17[%c0_39, %c0_40] : memref<36x256xbf16, #tpu.memory_space<vmem>>, vector<36x256xbf16>
    %cst_41 = arith.constant dense<0.000000e+00> : vector<4x256xf32>
    %43 = tpu.matmul %41, %42, %cst_41 {dimension_numbers = #tpu.dot_dimension_numbers<[1], [0], [0], [1], [0, 0, 1, 1], [], []>} : vector<4x36xbf16>, vector<36x256xbf16>, vector<4x256xf32> -> vector<4x256xf32>
    %44 = vector.broadcast %10 : vector<4x1xf32> to vector<4x256xf32>
    %45 = arith.addf %43, %44 : vector<4x256xf32>
    %c0_42 = arith.constant 0 : index
    %c0_43 = arith.constant 0 : index
    %46 = vector.load %arg7[%c0_42, %c0_43] : memref<4x1xf32, #tpu.memory_space<vmem>>, vector<4x1xf32>
    %c0_44 = arith.constant 0 : index
    %c0_45 = arith.constant 0 : index
    %47 = vector.load %arg8[%c0_44, %c0_45] : memref<4x1xf32, #tpu.memory_space<vmem>>, vector<4x1xf32>
    %cst_46 = arith.constant dense<0.000000e+00> : vector<4xf32>
    %48 = vector.multi_reduction <add>, %45, %cst_46 [1] : vector<4x256xf32> to vector<4xf32>
    %49 = vector.shape_cast %48 : vector<4xf32> to vector<4x1xf32>
    %50 = arith.mulf %45, %45 : vector<4x256xf32>
    %cst_47 = arith.constant dense<0.000000e+00> : vector<4xf32>
    %51 = vector.multi_reduction <add>, %50, %cst_47 [1] : vector<4x256xf32> to vector<4xf32>
    %52 = vector.shape_cast %51 : vector<4xf32> to vector<4x1xf32>
    %53 = tpu.concatenate %49, %52 in 1 : vector<4x1xf32>, vector<4x1xf32> -> vector<4x2xf32>
    %cst_48 = arith.constant dense<0.000000e+00> : vector<4x2xf32>
    %54 = tpu.matmul %5, %53, %cst_48 {dimension_numbers = #tpu.dot_dimension_numbers<[1], [0], [0], [1], [0, 0, 1, 1], [], []>} : vector<4x4xf32>, vector<4x2xf32>, vector<4x2xf32> -> vector<4x2xf32>
    %55 = vector.extract_strided_slice %54 {offsets = [0, 0], sizes = [4, 1], strides = [1, 1]} : vector<4x2xf32> to vector<4x1xf32>
    %56 = vector.extract_strided_slice %54 {offsets = [0, 1], sizes = [4, 1], strides = [1, 1]} : vector<4x2xf32> to vector<4x1xf32>
    %57 = arith.mulf %55, %55 : vector<4x1xf32>
    %58 = arith.subf %56, %57 : vector<4x1xf32>
    %cst_49 = arith.constant 9.99999974E-6 : f32
    %59 = vector.broadcast %cst_49 : f32 to vector<4x1xf32>
    %60 = arith.addf %58, %59 : vector<4x1xf32>
    %61 = math.rsqrt %60 : vector<4x1xf32>
    %62 = vector.broadcast %55 : vector<4x1xf32> to vector<4x256xf32>
    %63 = arith.subf %45, %62 : vector<4x256xf32>
    %64 = arith.mulf %61, %46 : vector<4x1xf32>
    %65 = vector.broadcast %64 : vector<4x1xf32> to vector<4x256xf32>
    %66 = arith.mulf %63, %65 : vector<4x256xf32>
    %67 = vector.broadcast %47 : vector<4x1xf32> to vector<4x256xf32>
    %68 = arith.addf %66, %67 : vector<4x256xf32>
    %69 = arith.negf %68 : vector<4x256xf32>
    %70 = math.exp %69 : vector<4x256xf32>
    %cst_50 = arith.constant 1.000000e+00 : f32
    %71 = vector.broadcast %cst_50 : f32 to vector<4x256xf32>
    %72 = arith.addf %71, %70 : vector<4x256xf32>
    %73 = arith.divf %71, %72 : vector<4x256xf32>
    %74 = arith.mulf %68, %73 : vector<4x256xf32>
    %75 = arith.truncf %74 : vector<4x256xf32> to vector<4x256xbf16>
    %c0_51 = arith.constant 0 : index
    %c17_52 = arith.constant 17 : index
    %76 = vector.load %arg16[%c0_51, %c17_52] : memref<4x290xbf16, #tpu.memory_space<vmem>>, vector<4x256xbf16>
    tpu.vector_store %arg16[%c0_51, %c17_52], %75 {strides = array<i32>} : memref<4x290xbf16, #tpu.memory_space<vmem>>, vector<4x256xbf16>,
    %c0_53 = arith.constant 0 : index
    %c0_54 = arith.constant 0 : index
    %77 = vector.load %arg10[%c0_53, %c0_54] : memref<4x1xf32, #tpu.memory_space<vmem>>, vector<4x1xf32>
    %c0_55 = arith.constant 0 : index
    %c0_56 = arith.constant 0 : index
    %78 = vector.load %arg16[%c0_55, %c0_56] : memref<4x290xbf16, #tpu.memory_space<vmem>>, vector<4x256xbf16>
    %79 = vector.broadcast %3 : vector<1x256xbf16> to vector<4x256xbf16>
    %80 = arith.mulf %78, %79 : vector<4x256xbf16>
    %c0_57 = arith.constant 0 : index
    %c0_58 = arith.constant 0 : index
    %81 = vector.load %arg17[%c0_57, %c0_58] : memref<36x256xbf16, #tpu.memory_space<vmem>>, vector<4x256xbf16>
    tpu.vector_store %arg17[%c0_57, %c0_58], %80 {strides = array<i32>} : memref<36x256xbf16, #tpu.memory_space<vmem>>, vector<4x256xbf16>,
    %c0_59 = arith.constant 0 : index
    %c1_60 = arith.constant 1 : index
    %82 = vector.load %arg16[%c0_59, %c1_60] : memref<4x290xbf16, #tpu.memory_space<vmem>>, vector<4x256xbf16>
    %c4_61 = arith.constant 4 : index
    %c0_62 = arith.constant 0 : index
    %83 = vector.load %arg17[%c4_61, %c0_62] : memref<36x256xbf16, #tpu.memory_space<vmem>>, vector<4x256xbf16>
    tpu.vector_store %arg17[%c4_61, %c0_62], %82 {strides = array<i32>} : memref<36x256xbf16, #tpu.memory_space<vmem>>, vector<4x256xbf16>,
    %c0_63 = arith.constant 0 : index
    %c2_64 = arith.constant 2 : index
    %84 = vector.load %arg16[%c0_63, %c2_64] : memref<4x290xbf16, #tpu.memory_space<vmem>>, vector<4x256xbf16>
    %85 = vector.broadcast %4 : vector<1x256xbf16> to vector<4x256xbf16>
    %86 = arith.mulf %84, %85 : vector<4x256xbf16>
    %c8_65 = arith.constant 8 : index
    %c0_66 = arith.constant 0 : index
    %87 = vector.load %arg17[%c8_65, %c0_66] : memref<36x256xbf16, #tpu.memory_space<vmem>>, vector<4x256xbf16>
    tpu.vector_store %arg17[%c8_65, %c0_66], %86 {strides = array<i32>} : memref<36x256xbf16, #tpu.memory_space<vmem>>, vector<4x256xbf16>,
    %c0_67 = arith.constant 0 : index
    %c16_68 = arith.constant 16 : index
    %88 = vector.load %arg16[%c0_67, %c16_68] : memref<4x290xbf16, #tpu.memory_space<vmem>>, vector<4x256xbf16>
    %89 = vector.broadcast %3 : vector<1x256xbf16> to vector<4x256xbf16>
    %90 = arith.mulf %88, %89 : vector<4x256xbf16>
    %c12_69 = arith.constant 12 : index
    %c0_70 = arith.constant 0 : index
    %91 = vector.load %arg17[%c12_69, %c0_70] : memref<36x256xbf16, #tpu.memory_space<vmem>>, vector<4x256xbf16>
    tpu.vector_store %arg17[%c12_69, %c0_70], %90 {strides = array<i32>} : memref<36x256xbf16, #tpu.memory_space<vmem>>, vector<4x256xbf16>,
    %c0_71 = arith.constant 0 : index
    %c17_72 = arith.constant 17 : index
    %92 = vector.load %arg16[%c0_71, %c17_72] : memref<4x290xbf16, #tpu.memory_space<vmem>>, vector<4x256xbf16>
    %c16_73 = arith.constant 16 : index
    %c0_74 = arith.constant 0 : index
    %93 = vector.load %arg17[%c16_73, %c0_74] : memref<36x256xbf16, #tpu.memory_space<vmem>>, vector<4x256xbf16>
    tpu.vector_store %arg17[%c16_73, %c0_74], %92 {strides = array<i32>} : memref<36x256xbf16, #tpu.memory_space<vmem>>, vector<4x256xbf16>,
    %c0_75 = arith.constant 0 : index
    %c18_76 = arith.constant 18 : index
    %94 = vector.load %arg16[%c0_75, %c18_76] : memref<4x290xbf16, #tpu.memory_space<vmem>>, vector<4x256xbf16>
    %95 = vector.broadcast %4 : vector<1x256xbf16> to vector<4x256xbf16>
    %96 = arith.mulf %94, %95 : vector<4x256xbf16>
    %c20_77 = arith.constant 20 : index
    %c0_78 = arith.constant 0 : index
    %97 = vector.load %arg17[%c20_77, %c0_78] : memref<36x256xbf16, #tpu.memory_space<vmem>>, vector<4x256xbf16>
    tpu.vector_store %arg17[%c20_77, %c0_78], %96 {strides = array<i32>} : memref<36x256xbf16, #tpu.memory_space<vmem>>, vector<4x256xbf16>,
    %c0_79 = arith.constant 0 : index
    %c32_80 = arith.constant 32 : index
    %98 = vector.load %arg16[%c0_79, %c32_80] : memref<4x290xbf16, #tpu.memory_space<vmem>>, vector<4x256xbf16>
    %99 = vector.broadcast %3 : vector<1x256xbf16> to vector<4x256xbf16>
    %100 = arith.mulf %98, %99 : vector<4x256xbf16>
    %c24_81 = arith.constant 24 : index
    %c0_82 = arith.constant 0 : index
    %101 = vector.load %arg17[%c24_81, %c0_82] : memref<36x256xbf16, #tpu.memory_space<vmem>>, vector<4x256xbf16>
    tpu.vector_store %arg17[%c24_81, %c0_82], %100 {strides = array<i32>} : memref<36x256xbf16, #tpu.memory_space<vmem>>, vector<4x256xbf16>,
    %c0_83 = arith.constant 0 : index
    %c33_84 = arith.constant 33 : index
    %102 = vector.load %arg16[%c0_83, %c33_84] : memref<4x290xbf16, #tpu.memory_space<vmem>>, vector<4x256xbf16>
    %c28_85 = arith.constant 28 : index
    %c0_86 = arith.constant 0 : index
    %103 = vector.load %arg17[%c28_85, %c0_86] : memref<36x256xbf16, #tpu.memory_space<vmem>>, vector<4x256xbf16>
    tpu.vector_store %arg17[%c28_85, %c0_86], %102 {strides = array<i32>} : memref<36x256xbf16, #tpu.memory_space<vmem>>, vector<4x256xbf16>,
    %c0_87 = arith.constant 0 : index
    %c34_88 = arith.constant 34 : index
    %104 = vector.load %arg16[%c0_87, %c34_88] : memref<4x290xbf16, #tpu.memory_space<vmem>>, vector<4x256xbf16>
    %105 = vector.broadcast %4 : vector<1x256xbf16> to vector<4x256xbf16>
    %106 = arith.mulf %104, %105 : vector<4x256xbf16>
    %c32_89 = arith.constant 32 : index
    %c0_90 = arith.constant 0 : index
    %107 = vector.load %arg17[%c32_89, %c0_90] : memref<36x256xbf16, #tpu.memory_space<vmem>>, vector<4x256xbf16>
    tpu.vector_store %arg17[%c32_89, %c0_90], %106 {strides = array<i32>} : memref<36x256xbf16, #tpu.memory_space<vmem>>, vector<4x256xbf16>,
    %c0_91 = arith.constant 0 : index
    %c0_92 = arith.constant 0 : index
    %108 = vector.load %arg9[%c0_91, %c0_92] : memref<4x36xbf16, #tpu.memory_space<vmem>>, vector<4x36xbf16>
    %c0_93 = arith.constant 0 : index
    %c0_94 = arith.constant 0 : index
    %109 = vector.load %arg17[%c0_93, %c0_94] : memref<36x256xbf16, #tpu.memory_space<vmem>>, vector<36x256xbf16>
    %cst_95 = arith.constant dense<0.000000e+00> : vector<4x256xf32>
    %110 = tpu.matmul %108, %109, %cst_95 {dimension_numbers = #tpu.dot_dimension_numbers<[1], [0], [0], [1], [0, 0, 1, 1], [], []>} : vector<4x36xbf16>, vector<36x256xbf16>, vector<4x256xf32> -> vector<4x256xf32>
    %111 = vector.broadcast %77 : vector<4x1xf32> to vector<4x256xf32>
    %112 = arith.addf %110, %111 : vector<4x256xf32>
    %c0_96 = arith.constant 0 : index
    %c0_97 = arith.constant 0 : index
    %113 = vector.load %arg11[%c0_96, %c0_97] : memref<4x1xf32, #tpu.memory_space<vmem>>, vector<4x1xf32>
    %c0_98 = arith.constant 0 : index
    %c0_99 = arith.constant 0 : index
    %114 = vector.load %arg12[%c0_98, %c0_99] : memref<4x1xf32, #tpu.memory_space<vmem>>, vector<4x1xf32>
    %cst_100 = arith.constant dense<0.000000e+00> : vector<4xf32>
    %115 = vector.multi_reduction <add>, %112, %cst_100 [1] : vector<4x256xf32> to vector<4xf32>
    %116 = vector.shape_cast %115 : vector<4xf32> to vector<4x1xf32>
    %117 = arith.mulf %112, %112 : vector<4x256xf32>
    %cst_101 = arith.constant dense<0.000000e+00> : vector<4xf32>
    %118 = vector.multi_reduction <add>, %117, %cst_101 [1] : vector<4x256xf32> to vector<4xf32>
    %119 = vector.shape_cast %118 : vector<4xf32> to vector<4x1xf32>
    %120 = tpu.concatenate %116, %119 in 1 : vector<4x1xf32>, vector<4x1xf32> -> vector<4x2xf32>
    %cst_102 = arith.constant dense<0.000000e+00> : vector<4x2xf32>
    %121 = tpu.matmul %5, %120, %cst_102 {dimension_numbers = #tpu.dot_dimension_numbers<[1], [0], [0], [1], [0, 0, 1, 1], [], []>} : vector<4x4xf32>, vector<4x2xf32>, vector<4x2xf32> -> vector<4x2xf32>
    %122 = vector.extract_strided_slice %121 {offsets = [0, 0], sizes = [4, 1], strides = [1, 1]} : vector<4x2xf32> to vector<4x1xf32>
    %123 = vector.extract_strided_slice %121 {offsets = [0, 1], sizes = [4, 1], strides = [1, 1]} : vector<4x2xf32> to vector<4x1xf32>
    %124 = arith.mulf %122, %122 : vector<4x1xf32>
    %125 = arith.subf %123, %124 : vector<4x1xf32>
    %cst_103 = arith.constant 9.99999974E-6 : f32
    %126 = vector.broadcast %cst_103 : f32 to vector<4x1xf32>
    %127 = arith.addf %125, %126 : vector<4x1xf32>
    %128 = math.rsqrt %127 : vector<4x1xf32>
    %129 = vector.broadcast %122 : vector<4x1xf32> to vector<4x256xf32>
    %130 = arith.subf %112, %129 : vector<4x256xf32>
    %131 = arith.mulf %128, %113 : vector<4x1xf32>
    %132 = vector.broadcast %131 : vector<4x1xf32> to vector<4x256xf32>
    %133 = arith.mulf %130, %132 : vector<4x256xf32>
    %134 = vector.broadcast %114 : vector<4x1xf32> to vector<4x256xf32>
    %135 = arith.addf %133, %134 : vector<4x256xf32>
    %136 = arith.negf %135 : vector<4x256xf32>
    %137 = math.exp %136 : vector<4x256xf32>
    %cst_104 = arith.constant 1.000000e+00 : f32
    %138 = vector.broadcast %cst_104 : f32 to vector<4x256xf32>
    %139 = arith.addf %138, %137 : vector<4x256xf32>
    %140 = arith.divf %138, %139 : vector<4x256xf32>
    %141 = arith.mulf %135, %140 : vector<4x256xf32>
    %c0_105 = arith.constant 0 : index
    %c0_106 = arith.constant 0 : index
    %142 = vector.load %arg13[%c0_105, %c0_106] : memref<4x4xbf16, #tpu.memory_space<vmem>>, vector<4x4xbf16>
    %143 = arith.truncf %141 : vector<4x256xf32> to vector<4x256xbf16>
    %cst_107 = arith.constant dense<0.000000e+00> : vector<4x256xf32>
    %144 = tpu.matmul %142, %143, %cst_107 {dimension_numbers = #tpu.dot_dimension_numbers<[1], [0], [0], [1], [0, 0, 1, 1], [], []>} : vector<4x4xbf16>, vector<4x256xbf16>, vector<4x256xf32> -> vector<4x256xf32>
    %c0_108 = arith.constant 0 : index
    %c0_109 = arith.constant 0 : index
    %145 = vector.load %arg14[%c0_108, %c0_109] : memref<4x1xf32, #tpu.memory_space<vmem>>, vector<4x1xf32>
    %146 = vector.broadcast %145 : vector<4x1xf32> to vector<4x256xf32>
    %147 = arith.addf %144, %146 : vector<4x256xf32>
    %c0_110 = arith.constant 0 : index
    %c0_111 = arith.constant 0 : index
    %c0_112 = arith.constant 0 : index
    %148 = vector.load %arg15[%c0_110, %c0_111, %c0_112] : memref<1x4x256xf32, #tpu.memory_space<vmem>>, vector<1x4x256xf32>
    %149 = vector.shape_cast %148 : vector<1x4x256xf32> to vector<4x256xf32>
    %150 = vector.shape_cast %147 : vector<4x256xf32> to vector<1x4x256xf32>
    tpu.vector_store %arg15[%c0_110, %c0_111, %c0_112], %150 {strides = array<i32>} : memref<1x4x256xf32, #tpu.memory_space<vmem>>, vector<1x4x256xf32>,
    return
  }
  func.func @transform_0(%arg0: i32) -> (i32, i32, i32) {
    %c0_i32 = arith.constant 0 : i32
    %c0_i32_0 = arith.constant 0 : i32
    %c0_i32_1 = arith.constant 0 : i32
    return %arg0, %c0_i32, %c0_i32_0 : i32, i32, i32
  }
  func.func @transform_1(%arg0: i32) -> (i32, i32) {
    %c0_i32 = arith.constant 0 : i32
    %c0_i32_0 = arith.constant 0 : i32
    %c0_i32_1 = arith.constant 0 : i32
    return %c0_i32, %c0_i32_0 : i32, i32
  }
  func.func @transform_2(%arg0: i32) -> (i32, i32) {
    %c0_i32 = arith.constant 0 : i32
    %c0_i32_0 = arith.constant 0 : i32
    %c0_i32_1 = arith.constant 0 : i32
    return %c0_i32, %c0_i32_0 : i32, i32
  }
  func.func @transform_3(%arg0: i32) -> (i32, i32) {
    %c0_i32 = arith.constant 0 : i32
    %c0_i32_0 = arith.constant 0 : i32
    %c0_i32_1 = arith.constant 0 : i32
    return %c0_i32, %c0_i32_0 : i32, i32
  }
  func.func @transform_4(%arg0: i32) -> (i32, i32) {
    %c0_i32 = arith.constant 0 : i32
    %c0_i32_0 = arith.constant 0 : i32
    %c0_i32_1 = arith.constant 0 : i32
    return %c0_i32, %c0_i32_0 : i32, i32
  }
  func.func @transform_5(%arg0: i32) -> (i32, i32) {
    %c0_i32 = arith.constant 0 : i32
    %c0_i32_0 = arith.constant 0 : i32
    %c0_i32_1 = arith.constant 0 : i32
    return %c0_i32, %c0_i32_0 : i32, i32
  }
  func.func @transform_6(%arg0: i32) -> (i32, i32) {
    %c0_i32 = arith.constant 0 : i32
    %c0_i32_0 = arith.constant 0 : i32
    %c0_i32_1 = arith.constant 0 : i32
    return %c0_i32, %c0_i32_0 : i32, i32
  }
  func.func @transform_7(%arg0: i32) -> (i32, i32) {
    %c0_i32 = arith.constant 0 : i32
    %c0_i32_0 = arith.constant 0 : i32
    %c0_i32_1 = arith.constant 0 : i32
    return %c0_i32, %c0_i32_0 : i32, i32
  }
  func.func @transform_8(%arg0: i32) -> (i32, i32) {
    %c0_i32 = arith.constant 0 : i32
    %c0_i32_0 = arith.constant 0 : i32
    %c0_i32_1 = arith.constant 0 : i32
    return %c0_i32, %c0_i32_0 : i32, i32
  }
  func.func @transform_9(%arg0: i32) -> (i32, i32) {
    %c0_i32 = arith.constant 0 : i32
    %c0_i32_0 = arith.constant 0 : i32
    %c0_i32_1 = arith.constant 0 : i32
    return %c0_i32, %c0_i32_0 : i32, i32
  }
  func.func @transform_10(%arg0: i32) -> (i32, i32) {
    %c0_i32 = arith.constant 0 : i32
    %c0_i32_0 = arith.constant 0 : i32
    %c0_i32_1 = arith.constant 0 : i32
    return %c0_i32, %c0_i32_0 : i32, i32
  }
  func.func @transform_11(%arg0: i32) -> (i32, i32) {
    %c0_i32 = arith.constant 0 : i32
    %c0_i32_0 = arith.constant 0 : i32
    %c0_i32_1 = arith.constant 0 : i32
    return %c0_i32, %c0_i32_0 : i32, i32
  }
  func.func @transform_12(%arg0: i32) -> (i32, i32) {
    %c0_i32 = arith.constant 0 : i32
    %c0_i32_0 = arith.constant 0 : i32
    %c0_i32_1 = arith.constant 0 : i32
    return %c0_i32, %c0_i32_0 : i32, i32
  }
  func.func @transform_13(%arg0: i32) -> (i32, i32) {
    %c0_i32 = arith.constant 0 : i32
    %c0_i32_0 = arith.constant 0 : i32
    %c0_i32_1 = arith.constant 0 : i32
    return %c0_i32, %c0_i32_0 : i32, i32
  }
  func.func @transform_14(%arg0: i32) -> (i32, i32, i32) {
    %c0_i32 = arith.constant 0 : i32
    %c0_i32_0 = arith.constant 0 : i32
    %c0_i32_1 = arith.constant 0 : i32
    return %arg0, %c0_i32, %c0_i32_0 : i32, i32, i32
  }
}

</mosaic_0001>

<bundles_post_ra>
// kernel: tpu_custom_call.1
= control target key start
LH: loop header
LB: loop body
LE: loop exit
PB: predicated region body
PF: predicated region fallthrough
CT: control target
= control target key end

     0   :  { %s2306_s0 = inlined_call_operand.hbm [shape: f32[2,4,256], index: 0, kind: input, shape index: {}]   ;;  %s2307_s1 = inlined_call_operand.vmem [shape: bf16[1,256], index: 1, kind: input, shape index: {}]   ;;  %s2308_s2 = inlined_call_operand.vmem [shape: bf16[1,256], index: 2, kind: input, shape index: {}]   ;;  %s2309_s3 = inlined_call_operand.vmem [shape: f32[4,4], index: 3, kind: input, shape index: {}]   ;;  %s2310_s4 = inlined_call_operand.vmem [shape: bf16[4,36], index: 4, kind: input, shape index: {}]   ;;  %s2311_s5 = inlined_call_operand.vmem [shape: f32[4,1], index: 5, kind: input, shape index: {}]   ;;  %s2312_s6 = inlined_call_operand.vmem [shape: f32[4,1], index: 6, kind: input, shape index: {}]   ;;  %s2313_s7 = inlined_call_operand.vmem [shape: f32[4,1], index: 7, kind: input, shape index: {}]   ;;  %s2314_s8 = inlined_call_operand.vmem [shape: bf16[4,36], index: 8, kind: input, shape index: {}]   ;;  %s2315_s9 = inlined_call_operand.vmem [shape: f32[4,1], index: 9, kind: input, shape index: {}]   ;;  %s2316_s10 = inlined_call_operand.vmem [shape: f32[4,1], index: 10, kind: input, shape index: {}]   ;;  %s2317_s11 = inlined_call_operand.vmem [shape: f32[4,1], index: 11, kind: input, shape index: {}]   ;;  %s2318_s12 = inlined_call_operand.vmem [shape: bf16[4,4], index: 12, kind: input, shape index: {}]   ;;  %s2319_s13 = inlined_call_operand.vmem [shape: f32[4,1], index: 13, kind: input, shape index: {}]   ;;  %s2320_s14 = inlined_call_operand.hbm [shape: f32[2,4,256], index: 14, kind: output, shape index: {}]  }
   0x1   :  { %2337 = sst [smem:[#allocation16_spill]] %s2318_s12 }
   0x2   :  { %2338 = sst [smem:[#allocation17_spill]] %s2320_s14 }
   0x3   :  { %19 = vsyncpa [#allocation5], 0 }
   0x4   :  { %21 = vsyncpa [#allocation5 + $0x1], 0 }
   0x5   :  { %22 = vsyncpa [#allocation6], 0 }
   0x6   :  { %24 = vsyncpa [#allocation6 + $0x1], 0  ;;  %s1927_s29 = smov 0   ;;  %s1929_s30 = smov 0  }
   0x7   :  { %s1931_s15 = smov 0   ;;  %s1933_s16 = smov 0  }
   0x8 LB: > { %2339 = sst [smem:[#allocation10_spill]] %s1821_s29  ;;  %s1948_s17 = sadd.s32 4294967295, %s1833_s16   ;;  %s1833_s16 = sphi %s1933_s16, %s2369_s16   ;;  %s1829_s15 = sphi %s1931_s15, %s2371_s15   ;;  %s1825_s30 = sphi %s1929_s30, %s2373_s30   ;;  %s1821_s29 = sphi %s1927_s29, %s2372_s29  }
   0x9   : > { %2340 = sst [smem:[#allocation11_spill]] %s1829_s15  ;;  %s1577_s18 = sadd.s32 4294967294, %s1833_s16  }
   0xa   : > { %s1952_s19 = sadd.s32 1, %s1833_s16   ;;  %s37_s20 = sadd.s32 1, %s1829_s15 }
   0xb   : > { %2341 = sst [smem:[#allocation12_spill]] %s1952_s19  ;;  %s34_s21 = ssub.s32 %s1833_s16, %s1952_s19 }
   0xc   : > { %p44_p0 = scmp.ne.s32.totalorder %s1829_s15, %s1825_s30  ;;  %p35_p1 = scmp.eq.s32.totalorder %s34_s21, 0 }
   0xd   : > { %p45_p2 = scmp.eq.s32.totalorder %s1833_s16, 0  ;;  %p50_p3 = scmp.ne.s32.totalorder %s1825_s30, %s1821_s29 }
   0xe   : > { %p51_p4 = scmp.eq.s32.totalorder %s1948_s17, 0  ;;  %p347_p7 = scmp.eq.s32.totalorder %s1948_s17, 1 }
   0xf   : > { %s1964_s22 = scalar_select %p35_p1, %s1829_s15, %s37_s20  }
  0x10   : > { %p1966_p5 = por %p45_p2, %p44_p0  ;;  %p1970_p6 = por %p51_p4, %p50_p3 }
  0x11   : > { %2342 = sst [smem:[#allocation13_spill]] %s1964_s22  ;;  %p353_p8 = scmp.eq.s32.totalorder %s1577_s18, 1 }
  0x12   : > { %p1659_p10 = scmp.lt.s32.totalorder %s1833_s16, 2  ;;  %p1977_p11 = por %p347_p7, %p44_p0 }
  0x13   : > { %p1981_p12 = por %p353_p8, %p50_p3  ;;  %s412_s27 = sand.u32 1, %s1829_s15  }
  0x14   : > { %s2345_s25 = scalar_select %p1977_p11, 1, 0 }
  0x15   : > { %s2347_s26 = scalar_select %p1981_p12, 1, 0 }
  0x16   : > { %2346 = sst [smem:[#allocation14_spill]] %s2345_s25  ;;  %s1637_s28 = sshll.u32 %s1833_s16, 3 }
  0x17   : > { %2348 = sst [smem:[#allocation15_spill]] %s2347_s26  ;;  %s1580_s20 = sshll.u32 %s412_s27, 3 }
  0x18   : > { %s421_s19 = scalar_lea.hbm %s2306_s0, %s1637_s28  ;;  %s416_s18 = scalar_lea.vmem [#allocation4], %s1580_s20 }
  0x19   : > { %s423_s29 = sshll.u32 %s421_s19, 4  ;;  %s425_s14 = sshll.u32 %s416_s18, 4  ;;  %s424_s29 = int_to_ptr.hbm [resolvable:$true] %s423_s29  ;;  %s426_s14 = int_to_ptr.vmem [resolvable:$true] %s425_s14 }
  0x1a   : > { %p1992_p13 = pnand %p1659_p10, %p1966_p5  ;;  %p1583_p0 = scmp.ge.s32.totalorder %s1833_s16, 1 }
  0x1b   : > { %p430_p1 = scmp.lt.s32.totalorder %s1833_s16, 3  ;;  %s413_s15 = scalar_lea.sflag [#allocation5], %s412_s27 }
  0x1c   : > { %s1737_s26 = sshra.s32 %s424_s29, 4  ;;  %p1741_p3 = pneg %p1992_p13  ;;  %s1738_s26 = int_to_ptr.hbm [resolvable:$true] %s1737_s26 }
  0x1d   : > { %s1739_s25 = scalar_lea.hbm %s1738_s26, 8  ;;  %s1744_s23 = scalar_lea.hbm %s2306_s0, 16 }
  0x1e   : > { %p1740_p2 = scmp.ne.s32.totalorder %s1738_s26, %s1739_s25  ;;  %p1745_p5 = scmp.lt.s32.totalorder %s1738_s26, %s2306_s0 }
  0x1f   : > { %p1746_p8 = scmp.lt.s32.totalorder %s1744_s23, %s1739_s25 }
  0x20   : > { %p1742_p4 = pnand %p1741_p3, %p1740_p2 }
  0x21   : > { %p1747_p10 = por %p1746_p8, %p1745_p5 }
  0x22   : > { %p1743_p7 = pneg %p1742_p4 }
  0x24   : > { %p1748_p9 = pnand %p1747_p10, %p1743_p7 }
  0x26   : > { %1751 = shalt.err (!%p1748_p9)
}
  0x27   : > { %1654 = dma.hbm_to_vmem [thread:$0]  (!%p1992_p13), %s424_s29, 128, %s426_s14, %s413_s15  }
  0x28   : > { %p431_p2 = pnand %p1583_p0, %p430_p1 }
  0x29   : > { %s2013_s27 = sand.u32 (!%p431_p2), 1, %s1825_s30  }
  0x2a   : > { %434 = sbr.rel (%p431_p2) target bundleno = 2349 (0x92d), region = 76  ;;  %s2329_s25 = sshll.u32 (!%p431_p2), %s2013_s27, 3 }
  0x2b   : > { %s437_s26 = scalar_lea.sflag (!%p431_p2), [#allocation5], %s2013_s27  ;;  %s440_s21 = scalar_lea.vmem (!%p431_p2), [#allocation4], %s2329_s25 }
  0x2f   : > { %1812 = dma.done.wait (%p1970_p6), %s437_s26, 128  }
  0x30   : > { %1814 = vsyncadd (%p1970_p6), %s437_s26, 4294967168  ;;  %vm487_vm0 = vcmask 132096   ;;  %vm489_vm1 = vcmask 271496   ;;  %v1835_v0 = vmov 0   ;;  %v494_v1 = vld [vmem:[%s440_s21] sm:$0xff]  ;;  %vm504_vm2 = vcmask 1041408  }
  0x31   : > { %488 = vst.msk [vmem:[#allocation2] sm:$0x3] %vm487_vm0, %v1835_v0  ;;  %1710 = vset.pattern.permute.xlu1 %v1835_v0  ;;  %1713 = vset.pattern.permute.xlu2 %v1835_v0  ;;  %v491_v2 = vld [vmem:[%s2307_s1] sm:$0x3]  ;;  %s1836_s29 = smov 17   ;;  %vm539_vm3 = vcmask 1043456  }
  0x32   : > { %490 = vst.msk [vmem:[#allocation2 + $0x4] sm:$0x3] %vm489_vm1, %v1835_v0  ;;  %1716 = vset.pattern.permute.xlu0 %v1835_v0  ;;  %s1837_s15 = smov 16   ;;  %s1838_s24 = smov 32   ;;  %vm515_vm4 = vcmask 1041544   ;;  %vm516_vm5 = vcmask 1043458  }
  0x33   : > { %496 = vst [vmem:[#allocation1] ss:$2 sm:$0xff] %v494_v1  ;;  %vm517_vm6 = vmor %vm516_vm5, %vm515_vm4  ;;  %vm518_vm7 = vcmask 136196   ;;  %vm512_vm8 = vcmask 138240   ;;  %v492_v29 = vld [vmem:[%s2308_s2] sm:$0x3] }
  0x34   : > { %vm2038_vm9 = vmor %vm518_vm7, %vm517_vm6  ;;  %s1839_s22 = smov 34   ;;  %s1840_s23 = smov 18   ;;  %vm593_vm10 = vcmask 15360   ;;  %vm631_vm11 = vcmask 130048   ;;  %vm689_vm12 = vcmask 146432   ;;  %vm729_vm13 = vcmask 261120  }
  0x35   : > { %s1841_s28 = smov 2   ;;  %s1842_s20 = smov 111   ;;  %vm786_vm14 = vcmask 277504   ;;  %vm679_vm15 = vcmask 908288   ;;  %vm719_vm0 = vcmask 900096   ;;  %vm757_vm1 = vcmask 785408  }
  0x36   : > { %s1843_s26 = smov 110   ;;  %s1844_s21 = smov 96   ;;  %vm2336_vm4 = vcmask 777216   ;;  %vm567_vm5 = vcmask 1039360   ;;  %vm2335_vm6 = vcmask 769024   ;;  %vm2334_vm7 = vcmask 1031168  }
  0x37   : > { %s1845_s12 = smov 127   ;;  %s1846_s14 = smov 95  }
  0x38   : > { %s1849_s18 = smov 126   ;;  %s2360_s25 = sld [smem:[#allocation16_spill]] }
  0x39   : > { %s1646_s19 = sshll.u32 %s1948_s17, 3  ;;  %s1491_s17 = scalar_lea.sflag [#allocation6], %s2013_s27 }
  0x3a   : > { %v497_v3 = vld.sshfl [vmem:[#allocation1] sm:$0xff pattern:$0x75316420]  ;;  %v498_v4 = vld.sshfl [vmem:[#allocation1 + $0x8] sm:$0xff pattern:$0x75316420] }
  0x3b   : > { %v501_v5 = vpack.c.bf16 %v498_v4, %v497_v3  ;;  %524 = vst [vmem:[#allocation1] ss:$9 sm:$0xff] %v491_v2 }
  0x3d   : > { %v503_v6 = vrot.slane %v501_v5, 2 }
  0x3f   : > { %v507_v7 = vsel %vm504_vm2, %v501_v5, %v503_v6 }
  0x40   : > { %509 = vrot.lane.b32.xlu0 %v507_v7, %s1836_s29 }
  0x42   : > { %v525_v8 = vld [vmem:[#allocation1] sm:$0xff]  ;;  %v526_v9 = vld [vmem:[#allocation1 + $0x9] sm:$0xff] }
  0x43   : > { %v527_v10 = vpack.i.b16 %v525_v8, %v525_v8  ;;  %v530_v11 = vpack.i.b16 %v526_v9, %v526_v9 }
  0x45   : > { %v529_v12 = vperm.slane %v527_v10, 0  ;;  %v532_v13 = vperm.slane %v530_v11, 0 }
  0x47   : > { %v534_v14 = vunpack.c.l.bf16 %v529_v12  ;;  %v535_v15 = vunpack.c.l.bf16 %v532_v13 }
  0x49   : > { %v538_v16 = vrot.slane %v535_v15, 4 }
  0x4b   : > { %v2034_v17 = vsel %vm539_vm3, %v534_v14, %v538_v16 }
  0x4c   : > { %628 = vrot.lane.b32.xlu1 %v2034_v17, %s1837_s15  ;;  %726 = vrot.lane.b32.xlu2 %v2034_v17, %s1838_s24  ;;  %s1847_s15 = smov 94   ;;  %s1848_s24 = smov 112  }
  0xa6   : > { %v727_v3 = vpop.permute.xlu2 %726 }
  0xa7   : > { %v2083_v10 = vrot.slane %v727_v3, 4 }
  0xb2   : > { %v510_v18 = vpop.permute.xlu0 %509 }
  0xb3   : > { %v511_v20 = vrot.slane %v510_v18, 6 }
  0xb5   : > { %v513_v21 = vsel %vm512_vm8, %v511_v20, %v510_v18 }
  0xb6   : > { %520 = vst.msk [vmem:[#allocation2] sm:$0x3f] %vm2038_vm9, %v513_v21 }
  0xbd   : > { %v522_v22 = vld [vmem:[#allocation2] sm:$0xf] }
  0xbe   : > { %v533_v23 = vunpack.c.l.bf16 %v522_v22  ;;  %v551_v25 = vld [vmem:[#allocation2] sm:$0x3f]  ;;  %v629_v47 = vpop.permute.xlu1 %628 }
  0xbf   : > { %v571_v42 = vld [vmem:[#allocation2] sm:$0x3f]  ;;  %v2061_v52 = vrot.slane %v629_v47, 4 }
  0xc0   : > { %v542_v24 = vmul.f32 %v2034_v17, %v533_v23  ;;  %v583_v44 = vunpack.c.h.bf16 %v571_v42  ;;  %v582_v46 = vunpack.c.l.bf16 %v571_v42  ;;  %v625_v51 = vld [vmem:[#allocation2] sm:$0x3f] }
  0xc1   : > { %v627_v53 = vunpack.c.h.bf16 %v625_v51  ;;  %v2064_v54 = vsel %vm631_vm11, %v2061_v52, %v629_v47  ;;  %v626_v55 = vunpack.c.l.bf16 %v625_v51  ;;  %v683_v62 = vld [vmem:[#allocation2] sm:$0x3f]  ;;  %vm2332_vm11 = vcmask 293888  }
  0xc2   : > { %544 = vst [vmem:[#allocation1] ss:$2 sm:$0xff] %v542_v24  ;;  %v685_v1 = vunpack.c.h.bf16 %v683_v62  ;;  %v723_v4 = vld [vmem:[#allocation2] sm:$0x3f]  ;;  %v684_v13 = vunpack.c.l.bf16 %v683_v62 }
  0xc3   : > { %v636_v56 = vmul.f32 %v2061_v52, %v627_v53  ;;  %v635_v58 = vmul.f32 %v2064_v54, %v626_v55  ;;  %v665_v7 = vld [vmem:[#allocation2] sm:$0x3f]  ;;  %v725_v9 = vunpack.c.h.bf16 %v723_v4  ;;  %v724_v23 = vunpack.c.l.bf16 %v723_v4 }
  0xc4   : > { %v780_v16 = vld [vmem:[#allocation2] sm:$0x3f] }
  0xc5   : > { %v734_v12 = vmul.f32 %v2083_v10, %v725_v9  ;;  %v782_v24 = vunpack.c.h.bf16 %v780_v16 }
  0xc9   : > { %v545_v26 = vld.sshfl [vmem:[#allocation1] sm:$0xff pattern:$0x75316420]  ;;  %v546_v27 = vld.sshfl [vmem:[#allocation1 + $0x8] sm:$0xff pattern:$0x75316420] }
  0xca   : > { %554 = vst [vmem:[#allocation1 + $0x1] ss:$2 sm:$0xff] %v551_v25  ;;  %v549_v28 = vpack.c.bf16 %v546_v27, %v545_v26  ;;  %v2095_v26 = vsel %vm729_vm13, %v2083_v10, %v727_v3  ;;  %vm2330_vm13 = vcmask 31744  }
  0xcc   : > { %550 = vst [vmem:[#allocation3] sm:$0x33] %v549_v28 }
  0xd1   : > { %v2049_v30 = vld.sshfl [vmem:[#allocation1] sm:$0xff pattern:$0x75643120]  ;;  %v2051_v31 = vld.sshfl [vmem:[#allocation1 + $0x8] sm:$0xff pattern:$0x75643120] }
  0xd2   : > { %573 = vst [vmem:[#allocation1] ss:$9 sm:$0xff] %v492_v29  ;;  %v733_v29 = vmul.f32 %v2095_v26, %v724_v23 }
  0xd9   : > { %v575_v32 = vld [vmem:[#allocation1 + $0x9] sm:$0xff]  ;;  %v574_v33 = vld [vmem:[#allocation1] sm:$0xff] }
  0xda   : > { %v576_v34 = vpack.i.b16 %v574_v33, %v574_v33  ;;  %v579_v35 = vpack.i.b16 %v575_v32, %v575_v32 }
  0xdc   : > { %v578_v36 = vperm.slane %v576_v34, 0  ;;  %v581_v37 = vperm.slane %v579_v35, 0 }
  0xde   : > { %v585_v38 = vunpack.c.l.bf16 %v581_v37  ;;  %v584_v39 = vunpack.c.l.bf16 %v578_v36  ;;  %v761_v37 = vld [vmem:[#allocation2] sm:$0x3f] }
  0xe0   : > { %v588_v40 = vrot.slane %v585_v38, 4 }
  0xe2   : > { %v589_v41 = vsel %vm539_vm3, %v584_v39, %v588_v40 }
  0xe3   : > { %783 = vrot.lane.b32.xlu2 %v589_v41, %s1839_s22  ;;  %686 = vrot.lane.b32.xlu1 %v589_v41, %s1840_s23  ;;  %s1850_s23 = smov 1  }
  0xe4   : > { %590 = vrot.lane.b32.xlu0 %v589_v41, %s1841_s28 }
 0x13d   : > { %v784_v14 = vpop.permute.xlu2 %783 }
 0x13e   : > { %v2090_v22 = vrot.slane %v784_v14, 4 }
 0x140   : > { %v791_v27 = vmul.f32 %v2090_v22, %v782_v24  ;;  %v2106_v42 = vsel %vm786_vm14, %v2090_v22, %v784_v14 }
 0x155   : > { %v687_v59 = vpop.permute.xlu1 %686 }
 0x156   : > { %v591_v43 = vpop.permute.xlu0 %590  ;;  %v2074_v63 = vrot.slane %v687_v59, 4 }
 0x157   : > { %v2054_v45 = vrot.slane %v591_v43, 4 }
 0x158   : > { %v694_v2 = vmul.f32 %v2074_v63, %v685_v1  ;;  %v2086_v11 = vsel %vm689_vm12, %v2074_v63, %v687_v59  ;;  %vm2331_vm12 = vcmask 7168  }
 0x159   : > { %v2057_v48 = vsel %vm593_vm10, %v2054_v45, %v591_v43  ;;  %v598_v49 = vmul.f32 %v2054_v45, %v583_v44  ;;  %v693_v18 = vmul.f32 %v2086_v11, %v684_v13  ;;  %v781_v44 = vunpack.c.l.bf16 %v780_v16 }
 0x15a   : > { %v597_v50 = vmul.f32 %v2057_v48, %v582_v46  ;;  %vm2333_vm10 = vcmask 916480  }
 0x15b   : > { %603 = vst [vmem:[#allocation1 + $0x10] ss:$2 sm:$0xff] %v598_v49  ;;  %v790_v46 = vmul.f32 %v2106_v42, %v781_v44 }
 0x15c   : > { %601 = vst [vmem:[#allocation1] ss:$2 sm:$0xff] %v597_v50 }
 0x162   : > { %v2067_v57 = vld.sshfl [vmem:[#allocation1 + $0x10] sm:$0xff pattern:$0x75316420] }
 0x163   : > { %v2070_v60 = vld.sshfl [vmem:[#allocation1] sm:$0xff pattern:$0x75316420]  ;;  %v2072_v61 = vld.sshfl [vmem:[#allocation1 + $0x8] sm:$0xff pattern:$0x75316420] }
 0x164   : > { %641 = vst [vmem:[#allocation1 + $0x10] ss:$2 sm:$0xff] %v636_v56  ;;  %v610_v59 = vpack.c.bf16 %v2072_v61, %v2070_v60 }
 0x165   : > { %639 = vst [vmem:[#allocation1] ss:$2 sm:$0xff] %v635_v58  ;;  %v611_v58 = vpack.c.bf16 %v2067_v57, %v2067_v57 }
 0x16b   : > { %v2077_v5 = vld.sshfl [vmem:[#allocation1 + $0x10] sm:$0xff pattern:$0x75316420] }
 0x16c   : > { %699 = vst [vmem:[#allocation1 + $0x10] ss:$2 sm:$0xff] %v694_v2  ;;  %v2079_v6 = vld.sshfl [vmem:[#allocation1] sm:$0xff pattern:$0x75316420]  ;;  %v649_v62 = vpack.c.bf16 %v2077_v5, %v2077_v5 }
 0x16d   : > { %v2081_v8 = vld.sshfl [vmem:[#allocation1 + $0x8] sm:$0xff pattern:$0x75316420] }
 0x16e   : > { %667 = vst [vmem:[#allocation1] ss:$2 sm:$0xff] %v665_v7  ;;  %v653_v1 = vrot.slane %v649_v62, 6 }
 0x173   : > { %v702_v15 = vld.sshfl [vmem:[#allocation1 + $0x10] sm:$0xff pattern:$0x75316420] }
 0x174   : > { %739 = vst [vmem:[#allocation1 + $0x10] ss:$2 sm:$0xff] %v734_v12  ;;  %v707_v25 = vpack.c.bf16 %v702_v15, %v702_v15 }
 0x175   : > { %v670_v20 = vld.sshfl [vmem:[#allocation1 + $0x8] sm:$0xff pattern:$0x75643120]  ;;  %v668_v21 = vld.sshfl [vmem:[#allocation1] sm:$0xff pattern:$0x75643120] }
 0x176   : > { %674 = vrot.lane.b32.xlu0 %v670_v20, %s1842_s20  ;;  %672 = vrot.lane.b32.xlu2 %v668_v21, %s1842_s20  ;;  %697 = vst [vmem:[#allocation1] ss:$2 sm:$0xff] %v693_v18  ;;  %v711_v32 = vrot.slane %v707_v25, 6 }
 0x17b   : > { %v742_v28 = vld.sshfl [vmem:[#allocation1 + $0x10] sm:$0xff pattern:$0x75316420] }
 0x17c   : > { %v747_v33 = vpack.c.bf16 %v742_v28, %v742_v28  ;;  %796 = vst [vmem:[#allocation1 + $0x10] ss:$2 sm:$0xff] %v791_v27 }
 0x17d   : > { %v700_v34 = vld.sshfl [vmem:[#allocation1] sm:$0xff pattern:$0x75316420]  ;;  %v701_v35 = vld.sshfl [vmem:[#allocation1 + $0x8] sm:$0xff pattern:$0x75316420] }
 0x17e   : > { %714 = vrot.lane.b32.xlu2 %v711_v32, %s1843_s26  ;;  %752 = vrot.lane.b32.xlu1 %v747_v33, %s1844_s21  ;;  %737 = vst [vmem:[#allocation1] ss:$2 sm:$0xff] %v733_v29  ;;  %v706_v36 = vpack.c.bf16 %v701_v35, %v700_v34 }
 0x180   : > { %v710_v38 = vrot.slane %v706_v36, 6 }
 0x183   : > { %v799_v43 = vld.sshfl [vmem:[#allocation1 + $0x10] sm:$0xff pattern:$0x75316420] }
 0x184   : > { %v804_v47 = vpack.c.bf16 %v799_v43, %v799_v43 }
 0x185   : > { %v740_v39 = vld.sshfl [vmem:[#allocation1] sm:$0xff pattern:$0x75316420]  ;;  %v741_v40 = vld.sshfl [vmem:[#allocation1 + $0x8] sm:$0xff pattern:$0x75316420] }
 0x186   : > { %561 = vrot.lane.b32.xlu2 %v2051_v31, %s1845_s12  ;;  %712 = vrot.lane.b32.xlu1 %v710_v38, %s1843_s26  ;;  %v746_v41 = vpack.c.bf16 %v741_v40, %v740_v39  ;;  %764 = vst [vmem:[#allocation1 + $0x1] ss:$2 sm:$0xff] %v761_v37  ;;  %v648_v31 = vpack.c.bf16 %v2081_v8, %v2079_v6  ;;  %v521_v40 = vld [vmem:[%s2311_s5] sm:$0xf] }
 0x188   : > { %750 = vrot.lane.b32.xlu0 %v746_v41, %s1844_s21  ;;  %v652_v51 = vrot.slane %v648_v31, 6 }
 0x18d   : > { %v765_v49 = vld.sshfl [vmem:[#allocation1] sm:$0xff pattern:$0x75643120]  ;;  %v767_v50 = vld.sshfl [vmem:[#allocation1 + $0x8] sm:$0xff pattern:$0x75643120] }
 0x18e   : > { %769 = vrot.lane.b32.xlu2 %v765_v49, %s1846_s14  ;;  %809 = vrot.lane.b32.xlu1 %v804_v47, %s1847_s15  ;;  %794 = vst [vmem:[#allocation1] ss:$2 sm:$0xff] %v790_v46 }
 0x190   : > { %771 = vrot.lane.b32.xlu0 %v767_v50, %s1846_s14 }
 0x195   : > { %v797_v53 = vld.sshfl [vmem:[#allocation1] sm:$0xff pattern:$0x75316420]  ;;  %v798_v55 = vld.sshfl [vmem:[#allocation1 + $0x8] sm:$0xff pattern:$0x75316420] }
 0x196   : > { %654 = vrot.lane.b32.xlu2 %v652_v51, %s1848_s24  ;;  %559 = vrot.lane.b32.xlu1 %v2049_v30, %s1845_s12  ;;  %v803_v56 = vpack.c.bf16 %v798_v55, %v797_v53 }
 0x198   : > { %807 = vrot.lane.b32.xlu0 %v803_v56, %s1847_s15 }
 0x19e   : > { %616 = vrot.lane.b32.xlu1 %v611_v58, %s1849_s18 }
 0x1a0   : > { %614 = vrot.lane.b32.xlu0 %v610_v59, %s1849_s18 }
 0x1a6   : > { %826 = vperm.xlu1 %1710, %v521_v40  }
 0x1a8   : > { %656 = vrot.lane.b32.xlu0 %v653_v1, %s1848_s24 }
 0x1d0   : > { %v673_v30 = vpop.permute.xlu2 %672 }
 0x1d1   : > { %v676_v3 = vrot.slane %v673_v30, 4 }
 0x1d8   : > { %v715_v6 = vpop.permute.xlu2 %714 }
 0x1d9   : > { %v717_v9 = vrot.slane %v715_v6, 4 }
 0x1e0   : > { %v562_v61 = vpop.permute.xlu2 %561 }
 0x1e1   : > { %v564_v33 = vrot.slane %v562_v61, 4 }
 0x1e8   : > { %v675_v2 = vpop.permute.xlu0 %674  ;;  %v770_v21 = vpop.permute.xlu2 %769 }
 0x1e9   : > { %v677_v4 = vrot.slane %v675_v2, 4  ;;  %v773_v25 = vrot.slane %v770_v21, 4 }
 0x1eb   : > { %v678_v57 = vsel %vm539_vm3, %v676_v3, %v677_v4 }
 0x1ec   : > { %v680_v7 = vsel %vm679_vm15, %v673_v30, %v678_v57 }
 0x1ed   : > { %682 = vst [vmem:[#allocation3 + $0x10] sm:$0x33] %v680_v7 }
 0x1f0   : > { %v753_v60 = vpop.permute.xlu1 %752  ;;  %v655_v53 = vpop.permute.xlu2 %654 }
 0x1f1   : > { %v755_v13 = vrot.slane %v753_v60, 4  ;;  %v658_v62 = vrot.slane %v655_v53, 4 }
 0x1f8   : > { %v713_v8 = vpop.permute.xlu1 %712 }
 0x1f9   : > { %v716_v5 = vrot.slane %v713_v8, 4 }
 0x1fa   : > { %v751_v12 = vpop.permute.xlu0 %750 }
 0x1fb   : > { %v718_v14 = vsel %vm539_vm3, %v716_v5, %v717_v9  ;;  %v754_v15 = vrot.slane %v751_v12, 4 }
 0x1fc   : > { %v720_v16 = vsel %vm719_vm0, %v713_v8, %v718_v14 }
 0x1fd   : > { %722 = vst [vmem:[#allocation3 + $0x10] sm:$0xcc] %v720_v16  ;;  %v756_v18 = vsel %vm539_vm3, %v754_v15, %v755_v13 }
 0x1fe   : > { %v758_v20 = vsel %vm757_vm1, %v751_v12, %v756_v18  ;;  %v818_v18 = vld [vmem:[%s2310_s4] sm:$0x3] }
 0x1ff   : > { %760 = vst [vmem:[#allocation3 + $0x18] sm:$0x33] %v758_v20 }
 0x200   : > { %v810_v23 = vpop.permute.xlu1 %809 }
 0x201   : > { %v812_v36 = vrot.slane %v810_v23, 4 }
 0x202   : > { %v772_v24 = vpop.permute.xlu0 %771 }
 0x203   : > { %v774_v27 = vrot.slane %v772_v24, 4 }
 0x204   : > { %v1596_v7 = vld [vmem:[#allocation3 + $0x10] sm:$0xf]  ;;  %v1640_v60 = vld [vmem:[#allocation3 + $0x14] sm:$0xf] }
 0x205   : > { %v775_v28 = vsel %vm539_vm3, %v773_v25, %v774_v27 }
 0x206   : > { %v777_v29 = vsel %vm2336_vm4, %v770_v21, %v775_v28 }
 0x207   : > { %779 = vst [vmem:[#allocation3 + $0x18] sm:$0xcc] %v777_v29 }
 0x208   : > { %v560_v32 = vpop.permute.xlu1 %559 }
 0x209   : > { %v563_v34 = vrot.slane %v560_v32, 4 }
 0x20a   : > { %v808_v35 = vpop.permute.xlu0 %807 }
 0x20b   : > { %v566_v37 = vsel %vm539_vm3, %v563_v34, %v564_v33  ;;  %v811_v38 = vrot.slane %v808_v35, 4 }
 0x20c   : > { %v568_v39 = vsel %vm567_vm5, %v560_v32, %v566_v37 }
 0x20d   : > { %570 = vst [vmem:[#allocation3] sm:$0xcc] %v568_v39  ;;  %v813_v41 = vsel %vm539_vm3, %v811_v38, %v812_v36 }
 0x20e   : > { %v815_v43 = vsel %vm2335_vm6, %v808_v35, %v813_v41  ;;  %v1641_v30 = vld [vmem:[#allocation3 + $0x14] sm:$0xf0]  ;;  %v1598_v57 = vld [vmem:[#allocation3 + $0x18] sm:$0xf0]  ;;  %v2160_v41 = vld [vmem:[%s2309_s3] sm:$0xf] }
 0x20f   : > { %817 = vst [vmem:[#allocation3 + $0x20] sm:$0x33] %v815_v43  ;;  %v1597_v8 = vor.u32 %v1641_v30, %v1596_v7  ;;  %v1601_v9 = vor.u32 %v1640_v60, %v1598_v57 }
 0x210   : > { %v617_v44 = vpop.permute.xlu1 %616 }
 0x211   : > { %v619_v46 = vrot.slane %v617_v44, 4 }
 0x212   : > { %v615_v47 = vpop.permute.xlu0 %614 }
 0x213   : > { %v618_v49 = vrot.slane %v615_v47, 4 }
 0x214   : > { %v1588_v5 = vld [vmem:[#allocation3] sm:$0xf]  ;;  %v1638_v13 = vld [vmem:[#allocation3 + $0x4] sm:$0xf] }
 0x215   : > { %v620_v50 = vsel %vm539_vm3, %v618_v49, %v619_v46  ;;  %v1851_v49 = vmov 1  }
 0x216   : > { %v622_v31 = vsel %vm2334_vm7, %v615_v47, %v620_v50  ;;  %v823_v51 = vld [vmem:[#allocation3 + $0x20] sm:$0x33]  ;;  %v890_v47 = vld [vmem:[%s2312_s6] sm:$0xf] }
 0x217   : > { %624 = vst [vmem:[#allocation3 + $0x8] sm:$0x33] %v622_v31  ;;  %v842_v55 = vunpack.c.l.b16 %v823_v51  ;;  %v843_v56 = vunpack.c.h.b16 %v823_v51 }
 0x218   : > { %v827_v20 = vpop.permute.xlu1 %826 }
 0x219   : > { %v848_v58 = vpack.c.b16 %v842_v55, %v842_v55  ;;  %v849_v59 = vpack.c.b16 %v843_v56, %v843_v56 }
 0x21a   : > { %v657_v1 = vpop.permute.xlu0 %656 }
 0x21b   : > { %v659_v2 = vrot.slane %v657_v1, 4  ;;  %v859_v3 = vsel %vm504_vm2, %v848_v58, 0  ;;  %v862_v4 = vsel %vm504_vm2, %v849_v59, 0 }
 0x21c   : > { %869 = vmatpush.bf16.msra.mxu0 %v859_v3  ;;  %882 = vmatpush.bf16.msra.mxu1 %v862_v4  ;;  %v891_v3 = vld [vmem:[%s2313_s7] sm:$0xf] }
 0x21d   : > { %v660_v6 = vsel %vm539_vm3, %v658_v62, %v659_v2 }
 0x21e   : > { %v662_v61 = vsel %vm2333_vm10, %v655_v53, %v660_v6 }
 0x21f   : > { %664 = vst [vmem:[#allocation3 + $0x8] sm:$0xcc] %v662_v61 }
 0x220   : > { %870 = vmatpush.bf16.msra.mxu0 %v1597_v8  ;;  %883 = vmatpush.bf16.msra.mxu1 %v1601_v9 }
 0x226   : > { %v1639_v12 = vld [vmem:[#allocation3 + $0x4] sm:$0xf0]  ;;  %v1590_v14 = vld [vmem:[#allocation3 + $0x8] sm:$0xf0] }
 0x227   : > { %v1589_v15 = vor.u32 %v1639_v12, %v1588_v5  ;;  %v1593_v16 = vor.u32 %v1638_v13, %v1590_v14 }
 0x229   : > { %871 = vmatpush.bf16.msra.mxu0 %v1589_v15  ;;  %884 = vmatpush.bf16.msra.mxu1 %v1593_v16 }
 0x22c   : > { %1602 = vmatmul.msk.bf16.vlgmr.msra.gmra.mxu0 %vm2332_vm11, %v818_v18  ;;  %1603 = vmatmul.msk.bf16.vlgmr.msra.gmra.mxu1 %vm2332_vm11, %v818_v18 }
 0x2a9   : > { %v873_v21 = vpop.f32.mrf.mxu0  ;;  %v886_v23 = vpop.f32.mrf.mxu1 }
 0x2aa   : > { %v874_v24 = vadd.f32 %v873_v21, %v827_v20  ;;  %v887_v25 = vadd.f32 %v886_v23, %v827_v20 }
 0x2ac   : > { %v892_v27 = vsel %vm539_vm3, %v874_v24, 0.0  ;;  %v893_v28 = vsel %vm539_vm3, %v887_v25, 0.0  ;;  %v897_v29 = vmul.f32 %v874_v24, %v874_v24  ;;  %v898_v32 = vmul.f32 %v887_v25, %v887_v25 }
 0x2ad   : > { %v894_v33 = vadd.f32 %v893_v28, %v892_v27 }
 0x2ae   : > { %v899_v34 = vsel %vm539_vm3, %v897_v29, 0.0  ;;  %v900_v35 = vsel %vm539_vm3, %v898_v32, 0.0 }
 0x2af   : > { %895 = vadd.xlane.f32.xlu2 %v894_v33  ;;  %v901_v36 = vadd.f32 %v900_v35, %v899_v34 }
 0x2b1   : > { %v875_v37 = vpop.f32.mrf.mxu0  ;;  %v888_v38 = vpop.f32.mrf.mxu1  ;;  %902 = vadd.xlane.f32.xlu0 %v901_v36 }
 0x322   : > { %v896_v39 = vpop.xlane.xlu2 %895 }
 0x324   : > { %v903_v40 = vpop.xlane.xlu0 %902 }
 0x325   : > { %v905_v43 = vsel %vm2331_vm12, %v896_v39, %v903_v40 }
 0x326   : > { %1604 = vmatpush.msk.msra.mxu2 %vm539_vm3, %v905_v43 }
 0x327   : > { %1605 = vmatmul.msk.f32.vlgmr.msra.gmra.mxu2 %vm2330_vm13, %v2160_v41 }
 0x3aa   : > { %v930_v44 = vpop.f32.mrf.mxu2 }
 0x3ab   : > { %v933_v46 = vmul.f32 %v930_v44, %v930_v44 }
 0x3ad   : > { %935 = vrot.lane.b32.xlu1 %v933_v46, %s1850_s23 }
 0x3b5   : > { %958 = vrot.lane.b32.xlu1 %v890_v47, %s1850_s23 }
 0x3bd   : > { %952 = vperm.xlu1 %1710, %v930_v44  }
 0x3c5   : > { %1711 = vset.pattern.permute.xlu1 %v1851_v49 }
 0x41f   : > { %v936_v50 = vpop.permute.xlu1 %935 }
 0x420   : > { %v938_v31 = vsub.f32 %v930_v44, %v936_v50 }
 0x422   : > { %v939_v51 = vadd.f32 1e-05, %v938_v31 }
 0x424   : > { %1717 = vrsqrt.f32 %v939_v51  ;;  %vm946_vm13 = vweird.f32 %v939_v51 }
 0x427   : > { %v959_v30 = vpop.permute.xlu1 %958 }
 0x42a   : > { %v1718_v53 = vpop.eup %1717 }
 0x42b   : > { %v941_v55 = vmul.f32 %v1718_v53, %v939_v51  ;;  %vm947_vm14 = vweird.f32 %v1718_v53 }
 0x42c   : > { %vm948_vm12 = vmor %vm946_vm13, %vm947_vm14 }
 0x42d   : > { %v942_v56 = vmul.f32 %v1718_v53, %v941_v55 }
 0x42f   : > { %v943_v58 = vmul.f32 0.5, %v942_v56  ;;  %v953_v4 = vpop.permute.xlu1 %952 }
 0x430   : > { %v955_v6 = vsub.f32 %v874_v24, %v953_v4  ;;  %v956_v7 = vsub.f32 %v887_v25, %v953_v4 }
 0x431   : > { %v944_v59 = vsub.f32 1.5, %v943_v58 }
 0x433   : > { %v945_v62 = vmul.f32 %v1718_v53, %v944_v59 }
 0x435   : > { %v949_v1 = vsel %vm948_vm12, %v1718_v53, %v945_v62 }
 0x436   : > { %v961_v2 = vmul.f32 %v959_v30, %v949_v1 }
 0x438   : > { %964 = vperm.xlu1 %1711, %v961_v2  }
 0x440   : > { %1712 = vset.pattern.permute.xlu1 %v1835_v0 }
 0x441   : > { %971 = vperm.xlu1 %1712, %v891_v3  }
 0x4aa   : > { %v965_v57 = vpop.permute.xlu1 %964 }
 0x4ab   : > { %v967_v60 = vmul.f32 %v965_v57, %v955_v6  ;;  %v968_v61 = vmul.f32 %v965_v57, %v956_v7 }
 0x4b3   : > { %v972_v8 = vpop.permute.xlu1 %971 }
 0x4b4   : > { %v974_v9 = vadd.f32 %v972_v8, %v967_v60  ;;  %v975_v5 = vadd.f32 %v972_v8, %v968_v61 }
 0x4b6   : > { %v1606_v12 = vmul.f32 -1.442695, %v974_v9  ;;  %v1607_v13 = vmul.f32 -1.442695, %v975_v5 }
 0x4b8   : > { %1719 = vpow2.f32 %v1606_v12 }
 0x4b9   : > { %1721 = vpow2.f32 %v1607_v13 }
 0x4be   : > { %v1720_v14 = vpop.eup %1719 }
 0x4bf   : > { %v1722_v15 = vpop.eup %1721  ;;  %v982_v16 = vadd.f32 1.0, %v1720_v14 }
 0x4c0   : > { %v983_v18 = vadd.f32 1.0, %v1722_v15 }
 0x4c1   : > { %1723 = vrcp.f32 %v982_v16  ;;  %v995_v27 = vand.u32 2147483648, %v982_v16  ;;  %v993_v32 = vand.u32 2147483647, %v982_v16  ;;  %vm989_vm14 = vweird.f32 %v982_v16 }
 0x4c2   : > { %1725 = vrcp.f32 %v983_v18  ;;  %v1010_v33 = vand.u32 2147483648, %v983_v18  ;;  %v1008_v35 = vand.u32 2147483647, %v983_v18  ;;  %vm1004_vm10 = vweird.f32 %v983_v18 }
 0x4c3   : > { %v996_v37 = vor.u32 1.1754944e-38, %v995_v27  ;;  %vm994_vm7 = vcmp.eq.f32.partialorder %v993_v32, 8.507059e+37 }
 0x4c4   : > { %v1011_v40 = vor.u32 1.1754944e-38, %v1010_v33  ;;  %vm1009_vm4 = vcmp.eq.f32.partialorder %v1008_v35, 8.507059e+37 }
 0x4c7   : > { %v1724_v20 = vpop.eup %1723 }
 0x4c8   : > { %v1726_v21 = vpop.eup %1725  ;;  %v985_v23 = vmul.f32 %v1724_v20, %v982_v16  ;;  %vm990_vm12 = vweird.f32 %v1724_v20 }
 0x4c9   : > { %v1000_v24 = vmul.f32 %v1726_v21, %v983_v18  ;;  %vm1005_vm13 = vweird.f32 %v1726_v21  ;;  %vm991_vm11 = vmor %vm989_vm14, %vm990_vm12 }
 0x4ca   : > { %v986_v25 = vsub.f32 1.0, %v985_v23  ;;  %vm1006_vm6 = vmor %vm1004_vm10, %vm1005_vm13 }
 0x4cb   : > { %v1001_v28 = vsub.f32 1.0, %v1000_v24 }
 0x4cc   : > { %v987_v29 = vmul.f32 %v1724_v20, %v986_v25 }
 0x4cd   : > { %v1002_v34 = vmul.f32 %v1726_v21, %v1001_v28 }
 0x4ce   : > { %v988_v36 = vadd.f32 %v1724_v20, %v987_v29 }
 0x4cf   : > { %v1003_v38 = vadd.f32 %v1726_v21, %v1002_v34 }
 0x4d0   : > { %v992_v39 = vsel %vm991_vm11, %v1724_v20, %v988_v36 }
 0x4d1   : > { %v997_v43 = vsel %vm994_vm7, %v996_v37, %v992_v39  ;;  %v1007_v44 = vsel %vm1006_vm6, %v1726_v21, %v1003_v38  ;;  %vm2359_vm6 = vcmask 31744  }
 0x4d2   : > { %v1012_v46 = vsel %vm1009_vm4, %v1011_v40, %v1007_v44  ;;  %v1014_v47 = vmul.f32 %v997_v43, %v974_v9 }
 0x4d3   : > { %v1015_v50 = vmul.f32 %v1012_v46, %v975_v5 }
 0x4d5   : > { %v1016_v31 = vpack.c.bf16 %v1015_v50, %v1014_v47 }
 0x4d7   : > { %v1018_v51 = vrot.slane %v1016_v31, 2 }
 0x4d9   : > { %v1021_v53 = vsel %vm504_vm2, %v1016_v31, %v1018_v51 }
 0x4da   : > { %1023 = vrot.lane.b32.xlu2 %v1021_v53, %s1836_s29 }
 0x534   : > { %v1024_v55 = vpop.permute.xlu2 %1023 }
 0x535   : > { %v1025_v56 = vrot.slane %v1024_v55, 6 }
 0x537   : > { %v1026_v58 = vsel %vm512_vm8, %v1025_v56, %v1024_v55  ;;  %vm2352_vm8 = vcmask 777216  }
 0x538   : > { %1028 = vst.msk [vmem:[#allocation2] sm:$0x3f] %vm2038_vm9, %v1026_v58  ;;  %vm2353_vm9 = vcmask 769024  }
 0x53f   : > { %v1030_v59 = vld [vmem:[#allocation2] sm:$0xf] }
 0x540   : > { %v1059_v62 = vld [vmem:[#allocation2] sm:$0x3f]  ;;  %v1031_v1 = vunpack.c.l.bf16 %v1030_v59 }
 0x541   : > { %v1061_v30 = vunpack.c.h.bf16 %v1059_v62  ;;  %v1089_v4 = vld [vmem:[#allocation2] sm:$0x3f]  ;;  %v1060_v5 = vunpack.c.l.bf16 %v1059_v62 }
 0x542   : > { %v1032_v2 = vmul.f32 %v1031_v1, %v2034_v17  ;;  %v1091_v57 = vunpack.c.h.bf16 %v1089_v4  ;;  %v1041_v6 = vld [vmem:[#allocation2] sm:$0x3f]  ;;  %v1090_v16 = vunpack.c.l.bf16 %v1089_v4 }
 0x543   : > { %v1063_v3 = vmul.f32 %v1061_v30, %v2054_v45  ;;  %v1138_v7 = vld [vmem:[#allocation2] sm:$0x3f]  ;;  %v1062_v45 = vmul.f32 %v1060_v5, %v2057_v48 }
 0x544   : > { %1034 = vst [vmem:[#allocation1] ss:$2 sm:$0xff] %v1032_v2  ;;  %v1093_v8 = vmul.f32 %v1091_v57, %v2061_v52  ;;  %v1140_v17 = vunpack.c.h.bf16 %v1138_v7  ;;  %v1170_v12 = vld [vmem:[#allocation2] sm:$0x3f]  ;;  %v1092_v20 = vmul.f32 %v1090_v16, %v2064_v54  ;;  %v1139_v36 = vunpack.c.l.bf16 %v1138_v7 }
 0x545   : > { %1068 = vst [vmem:[#allocation1 + $0x10] ss:$2 sm:$0xff] %v1063_v3  ;;  %v1172_v18 = vunpack.c.h.bf16 %v1170_v12  ;;  %v1218_v21 = vld [vmem:[#allocation2] sm:$0x3f]  ;;  %v1171_v43 = vunpack.c.l.bf16 %v1170_v12 }
 0x546   : > { %v1142_v15 = vmul.f32 %v1140_v17, %v2074_v63  ;;  %v1220_v27 = vunpack.c.h.bf16 %v1218_v21  ;;  %v1121_v29 = vld [vmem:[#allocation2] sm:$0x3f]  ;;  %v1219_v55 = vunpack.c.l.bf16 %v1218_v21 }
 0x547   : > { %v1174_v24 = vmul.f32 %v1172_v18, %v2083_v10  ;;  %v1141_v10 = vmul.f32 %v1139_v36, %v2086_v11  ;;  %v1200_v11 = vld [vmem:[#allocation2] sm:$0x3f] }
 0x548   : > { %v1222_v34 = vmul.f32 %v1220_v27, %v2090_v22  ;;  %v1173_v22 = vmul.f32 %v1171_v43, %v2095_v26  ;;  %v1221_v56 = vmul.f32 %v1219_v55, %v2106_v42 }
 0x54b   : > { %v1035_v60 = vld.sshfl [vmem:[#allocation1] sm:$0xff pattern:$0x75316420]  ;;  %v1036_v61 = vld.sshfl [vmem:[#allocation1 + $0x8] sm:$0xff pattern:$0x75316420] }
 0x54c   : > { %1044 = vst [vmem:[#allocation1 + $0x1] ss:$2 sm:$0xff] %v1041_v6  ;;  %v2184_v19 = vld.sshfl [vmem:[#allocation1 + $0x10] sm:$0xff pattern:$0x75316420]  ;;  %v1039_v9 = vpack.c.bf16 %v1036_v61, %v1035_v60 }
 0x54d   : > { %1098 = vst [vmem:[#allocation1 + $0x10] ss:$2 sm:$0xff] %v1093_v8  ;;  %v1076_v26 = vpack.c.bf16 %v2184_v19, %v2184_v19 }
 0x54e   : > { %1040 = vst [vmem:[#allocation3] sm:$0x33] %v1039_v9 }
 0x553   : > { %v1045_v13 = vld.sshfl [vmem:[#allocation1] sm:$0xff pattern:$0x75643120]  ;;  %v1047_v14 = vld.sshfl [vmem:[#allocation1 + $0x8] sm:$0xff pattern:$0x75643120] }
 0x554   : > { %1066 = vst [vmem:[#allocation1] ss:$2 sm:$0xff] %v1062_v45  ;;  %1051 = vrot.lane.b32.xlu0 %v1047_v14, %s1845_s12  ;;  %1049 = vrot.lane.b32.xlu2 %v1045_v13, %s1845_s12  ;;  %v2190_v52 = vld.sshfl [vmem:[#allocation1 + $0x10] sm:$0xff pattern:$0x75316420] }
 0x555   : > { %1147 = vst [vmem:[#allocation1 + $0x10] ss:$2 sm:$0xff] %v1142_v15  ;;  %v1106_v42 = vpack.c.bf16 %v2190_v52, %v2190_v52 }
 0x557   : > { %v1110_v57 = vrot.slane %v1106_v42, 6 }
 0x55b   : > { %v1069_v23 = vld.sshfl [vmem:[#allocation1] sm:$0xff pattern:$0x75316420]  ;;  %v1070_v48 = vld.sshfl [vmem:[#allocation1 + $0x8] sm:$0xff pattern:$0x75316420] }
 0x55c   : > { %1096 = vst [vmem:[#allocation1] ss:$2 sm:$0xff] %v1092_v20  ;;  %v1150_v25 = vld.sshfl [vmem:[#allocation1 + $0x10] sm:$0xff pattern:$0x75316420]  ;;  %v1075_v4 = vpack.c.bf16 %v1070_v48, %v1069_v23 }
 0x55d   : > { %v1155_v63 = vpack.c.bf16 %v1150_v25, %v1150_v25  ;;  %1179 = vst [vmem:[#allocation1 + $0x10] ss:$2 sm:$0xff] %v1174_v24 }
 0x55f   : > { %v1159_v28 = vrot.slane %v1155_v63, 6 }
 0x561   : > { %1162 = vrot.lane.b32.xlu0 %v1159_v28, %s1843_s26 }
 0x563   : > { %v1099_v32 = vld.sshfl [vmem:[#allocation1] sm:$0xff pattern:$0x75316420]  ;;  %v1100_v33 = vld.sshfl [vmem:[#allocation1 + $0x8] sm:$0xff pattern:$0x75316420] }
 0x564   : > { %1123 = vst [vmem:[#allocation1] ss:$2 sm:$0xff] %v1121_v29  ;;  %v1182_v54 = vld.sshfl [vmem:[#allocation1 + $0x10] sm:$0xff pattern:$0x75316420]  ;;  %v1105_v62 = vpack.c.bf16 %v1100_v33, %v1099_v32 }
 0x565   : > { %v1187_v35 = vpack.c.bf16 %v1182_v54, %v1182_v54  ;;  %1227 = vst [vmem:[#allocation1 + $0x10] ss:$2 sm:$0xff] %v1222_v34 }
 0x566   : > { %v1109_v1 = vrot.slane %v1105_v62, 6 }
 0x567   : > { %1192 = vrot.lane.b32.xlu2 %v1187_v35, %s1844_s21 }
 0x56b   : > { %v1124_v37 = vld.sshfl [vmem:[#allocation1] sm:$0xff pattern:$0x75643120]  ;;  %v1126_v38 = vld.sshfl [vmem:[#allocation1 + $0x8] sm:$0xff pattern:$0x75643120] }
 0x56c   : > { %1128 = vrot.lane.b32.xlu1 %v1124_v37, %s1842_s20  ;;  %v1230_v39 = vld.sshfl [vmem:[#allocation1 + $0x10] sm:$0xff pattern:$0x75316420]  ;;  %1145 = vst [vmem:[#allocation1] ss:$2 sm:$0xff] %v1141_v10 }
 0x56d   : > { %v1235_v40 = vpack.c.bf16 %v1230_v39, %v1230_v39  ;;  %v1029_v37 = vld [vmem:[%s2315_s9] sm:$0xf] }
 0x56f   : > { %1240 = vrot.lane.b32.xlu0 %v1235_v40, %s1847_s15 }
 0x573   : > { %v1148_v44 = vld.sshfl [vmem:[#allocation1] sm:$0xff pattern:$0x75316420]  ;;  %v1149_v46 = vld.sshfl [vmem:[#allocation1 + $0x8] sm:$0xff pattern:$0x75316420] }
 0x574   : > { %1130 = vrot.lane.b32.xlu1 %v1126_v38, %s1842_s20  ;;  %v1154_v47 = vpack.c.bf16 %v1149_v46, %v1148_v44  ;;  %1177 = vst [vmem:[#allocation1] ss:$2 sm:$0xff] %v1173_v22 }
 0x576   : > { %v1158_v50 = vrot.slane %v1154_v47, 6 }
 0x578   : > { %1160 = vrot.lane.b32.xlu2 %v1158_v50, %s1843_s26  ;;  %s2363_s26 = sld [smem:[#allocation17_spill]] }
 0x57b   : > { %v1180_v31 = vld.sshfl [vmem:[#allocation1] sm:$0xff pattern:$0x75316420]  ;;  %v1181_v51 = vld.sshfl [vmem:[#allocation1 + $0x8] sm:$0xff pattern:$0x75316420] }
 0x57c   : > { %v1186_v53 = vpack.c.bf16 %v1181_v51, %v1180_v31  ;;  %1203 = vst [vmem:[#allocation1 + $0x1] ss:$2 sm:$0xff] %v1200_v11 }
 0x57e   : > { %1190 = vrot.lane.b32.xlu1 %v1186_v53, %s1844_s21  ;;  %s1502_s21 = scalar_lea.hbm %s2363_s26, %s1646_s19  ;;  %s1787_s19 = scalar_lea.hbm %s2363_s26, 16 }
 0x580   : > { %1081 = vrot.lane.b32.xlu2 %v1076_v26, %s1849_s18 }
 0x583   : > { %v1204_v58 = vld.sshfl [vmem:[#allocation1] sm:$0xff pattern:$0x75643120]  ;;  %v1206_v59 = vld.sshfl [vmem:[#allocation1 + $0x8] sm:$0xff pattern:$0x75643120] }
 0x584   : > { %1208 = vrot.lane.b32.xlu0 %v1204_v58, %s1846_s14  ;;  %1225 = vst [vmem:[#allocation1] ss:$2 sm:$0xff] %v1221_v56 }
 0x586   : > { %1210 = vrot.lane.b32.xlu1 %v1206_v59, %s1846_s14  ;;  %s2365_s14 = sshll.u32 %s2013_s27, 3 }
 0x588   : > { %1256 = vperm.xlu2 %1713, %v1029_v37  }
 0x58b   : > { %v1228_v30 = vld.sshfl [vmem:[#allocation1] sm:$0xff pattern:$0x75316420]  ;;  %v1229_v2 = vld.sshfl [vmem:[#allocation1 + $0x8] sm:$0xff pattern:$0x75316420] }
 0x58c   : > { %1111 = vrot.lane.b32.xlu0 %v1109_v1, %s1848_s24  ;;  %v1234_v3 = vpack.c.bf16 %v1229_v2, %v1228_v30 }
 0x58e   : > { %1238 = vrot.lane.b32.xlu1 %v1234_v3, %s1847_s15  ;;  %s485_s15 = scalar_lea.vmem [#allocation7], %s2365_s14 }
 0x596   : > { %1079 = vrot.lane.b32.xlu1 %v1075_v4, %s1849_s18  ;;  %s1506_s18 = sshll.u32 %s1502_s21, 4  ;;  %s1507_s18 = int_to_ptr.hbm [resolvable:$true] %s1506_s18 }
 0x597   : > { %s1781_s22 = sshra.s32 %s1507_s18, 4  ;;  %s1782_s22 = int_to_ptr.hbm [resolvable:$true] %s1781_s22 }
 0x598   : > { %p1788_p0 = scmp.lt.s32.totalorder %s1782_s22, %s2363_s26 }
 0x59e   : > { %1113 = vrot.lane.b32.xlu1 %v1110_v57, %s1848_s24  ;;  %s1504_s24 = sshll.u32 %s485_s15, 4  ;;  %s1505_s24 = int_to_ptr.vmem [resolvable:$true] %s1504_s24 }
 0x5ae   : > { %v1050_v6 = vpop.permute.xlu2 %1049 }
 0x5af   : > { %v1053_v60 = vrot.slane %v1050_v6, 4 }
 0x5c1   : > { %v1193_v19 = vpop.permute.xlu2 %1192 }
 0x5c2   : > { %v1195_v24 = vrot.slane %v1193_v19, 4 }
 0x5c6   : > { %v1052_v7 = vpop.permute.xlu0 %1051 }
 0x5c7   : > { %v1054_v61 = vrot.slane %v1052_v7, 4 }
 0x5c9   : > { %v1055_v8 = vsel %vm539_vm3, %v1053_v60, %v1054_v61 }
 0x5ca   : > { %v1056_v9 = vsel %vm567_vm5, %v1050_v6, %v1055_v8  ;;  %vm2358_vm5 = vcmask 7168  }
 0x5cb   : > { %1058 = vst [vmem:[#allocation3] sm:$0xcc] %v1056_v9 }
 0x5d2   : > { %v1161_v5 = vpop.permute.xlu2 %1160  ;;  %v1610_v7 = vld [vmem:[#allocation3] sm:$0xf]  ;;  %v1642_v61 = vld [vmem:[#allocation3 + $0x4] sm:$0xf] }
 0x5d3   : > { %v1163_v17 = vpop.permute.xlu0 %1162  ;;  %v1164_v45 = vrot.slane %v1161_v5, 4 }
 0x5d4   : > { %v1165_v12 = vrot.slane %v1163_v17, 4 }
 0x5d6   : > { %v1166_v13 = vsel %vm539_vm3, %v1164_v45, %v1165_v12 }
 0x5d7   : > { %v1167_v14 = vsel %vm719_vm0, %v1161_v5, %v1166_v13  ;;  %vm2355_vm0 = vcmask 916480   ;;  %v1248_v5 = vld [vmem:[%s2314_s8] sm:$0x3] }
 0x5d8   : > { %1169 = vst [vmem:[#allocation3 + $0x10] sm:$0xcc] %v1167_v14 }
 0x5da   : > { %v1082_v40 = vpop.permute.xlu2 %1081 }
 0x5db   : > { %v1084_v22 = vrot.slane %v1082_v40, 4 }
 0x5de   : > { %v1129_v15 = vpop.permute.xlu1 %1128 }
 0x5df   : > { %v1132_v16 = vrot.slane %v1129_v15, 4 }
 0x5e1   : > { %v1241_v23 = vpop.permute.xlu0 %1240 }
 0x5e2   : > { %v1243_v36 = vrot.slane %v1241_v23, 4  ;;  %v1257_v17 = vpop.permute.xlu2 %1256 }
 0x5e6   : > { %v1131_v52 = vpop.permute.xlu1 %1130 }
 0x5e7   : > { %v1133_v18 = vrot.slane %v1131_v52, 4 }
 0x5e9   : > { %v1134_v20 = vsel %vm539_vm3, %v1132_v16, %v1133_v18 }
 0x5ea   : > { %v1135_v21 = vsel %vm679_vm15, %v1129_v15, %v1134_v20  ;;  %vm2354_vm15 = vcmask 1031168  }
 0x5eb   : > { %1137 = vst [vmem:[#allocation3 + $0x10] sm:$0x33] %v1135_v21 }
 0x5f0   : > { %v1191_v48 = vpop.permute.xlu1 %1190 }
 0x5f1   : > { %v1194_v25 = vrot.slane %v1191_v48, 4 }
 0x5f2   : > { %v1618_v3 = vld [vmem:[#allocation3 + $0x10] sm:$0xf]  ;;  %v1644_v4 = vld [vmem:[#allocation3 + $0x14] sm:$0xf] }
 0x5f3   : > { %v1196_v63 = vsel %vm539_vm3, %v1194_v25, %v1195_v24 }
 0x5f4   : > { %v1197_v27 = vsel %vm757_vm1, %v1191_v48, %v1196_v63  ;;  %vm2356_vm1 = vcmask 293888  }
 0x5f5   : > { %1199 = vst [vmem:[#allocation3 + $0x18] sm:$0x33] %v1197_v27  ;;  %vm2357_vm4 = vmmov %vm2356_vm1 }
 0x5f6   : > { %v1209_v28 = vpop.permute.xlu0 %1208 }
 0x5f7   : > { %v1212_v32 = vrot.slane %v1209_v28, 4 }
 0x5f8   : > { %v1211_v29 = vpop.permute.xlu1 %1210 }
 0x5f9   : > { %v1213_v33 = vrot.slane %v1211_v29, 4 }
 0x5fb   : > { %v1214_v34 = vsel %vm539_vm3, %v1212_v32, %v1213_v33  ;;  %v1319_v33 = vld [vmem:[%s2316_s10] sm:$0xf] }
 0x5fc   : > { %v1215_v54 = vsel %vm2352_vm8, %v1209_v28, %v1214_v34 }
 0x5fd   : > { %1217 = vst [vmem:[#allocation3 + $0x18] sm:$0xcc] %v1215_v54 }
 0x5fe   : > { %v1112_v51 = vpop.permute.xlu0 %1111 }
 0x5ff   : > { %v1115_v58 = vrot.slane %v1112_v51, 4 }
 0x600   : > { %v1239_v35 = vpop.permute.xlu1 %1238 }
 0x601   : > { %v1242_v10 = vrot.slane %v1239_v35, 4 }
 0x603   : > { %v1244_v38 = vsel %vm539_vm3, %v1242_v10, %v1243_v36 }
 0x604   : > { %v1245_v39 = vsel %vm2353_vm9, %v1239_v35, %v1244_v38  ;;  %v1645_v56 = vld [vmem:[#allocation3 + $0x14] sm:$0xf0]  ;;  %v1620_v30 = vld [vmem:[#allocation3 + $0x18] sm:$0xf0] }
 0x605   : > { %1247 = vst [vmem:[#allocation3 + $0x20] sm:$0x33] %v1245_v39  ;;  %v1619_v57 = vor.u32 %v1645_v56, %v1618_v3  ;;  %v1623_v6 = vor.u32 %v1644_v4, %v1620_v30 }
 0x608   : > { %v1080_v43 = vpop.permute.xlu1 %1079 }
 0x609   : > { %v1083_v44 = vrot.slane %v1080_v43, 4 }
 0x60b   : > { %v1085_v46 = vsel %vm539_vm3, %v1083_v44, %v1084_v22 }
 0x60c   : > { %v1086_v47 = vsel %vm2354_vm15, %v1080_v43, %v1085_v46  ;;  %v1253_v50 = vld [vmem:[#allocation3 + $0x20] sm:$0x33] }
 0x60d   : > { %1088 = vst [vmem:[#allocation3 + $0x8] sm:$0x33] %v1086_v47  ;;  %v1272_v11 = vunpack.c.l.b16 %v1253_v50  ;;  %v1273_v31 = vunpack.c.h.b16 %v1253_v50 }
 0x60f   : > { %v1278_v53 = vpack.c.b16 %v1272_v11, %v1272_v11  ;;  %v1279_v55 = vpack.c.b16 %v1273_v31, %v1273_v31 }
 0x610   : > { %v1114_v26 = vpop.permute.xlu1 %1113 }
 0x611   : > { %v1116_v59 = vrot.slane %v1114_v26, 4  ;;  %v1288_v62 = vsel %vm504_vm2, %v1278_v53, 0  ;;  %v1291_v1 = vsel %vm504_vm2, %v1279_v55, 0 }
 0x612   : > { %1298 = vmatpush.bf16.msra.mxu3 %v1288_v62  ;;  %1311 = vmatpush.bf16.msrb.mxu2 %v1291_v1 }
 0x613   : > { %v1117_v2 = vsel %vm539_vm3, %v1115_v58, %v1116_v59  ;;  %v1443_v58 = vld [vmem:[%s2319_s13] sm:$0xf] }
 0x614   : > { %v1118_v42 = vsel %vm2355_vm0, %v1112_v51, %v1117_v2 }
 0x615   : > { %1120 = vst [vmem:[#allocation3 + $0x8] sm:$0xcc] %v1118_v42 }
 0x616   : > { %1299 = vmatpush.bf16.msra.mxu3 %v1619_v57  ;;  %1312 = vmatpush.bf16.msrb.mxu2 %v1623_v6 }
 0x61c   : > { %v1643_v60 = vld [vmem:[#allocation3 + $0x4] sm:$0xf0]  ;;  %v1612_v8 = vld [vmem:[#allocation3 + $0x8] sm:$0xf0] }
 0x61d   : > { %v1611_v19 = vor.u32 %v1643_v60, %v1610_v7  ;;  %v1615_v9 = vor.u32 %v1642_v61, %v1612_v8 }
 0x61f   : > { %1300 = vmatpush.bf16.msra.mxu3 %v1611_v19  ;;  %1313 = vmatpush.bf16.msrb.mxu2 %v1615_v9 }
 0x622   : > { %1624 = vmatmul.msk.bf16.vlgmr.msra.gmra.mxu3 %vm2356_vm1, %v1248_v5  ;;  %1625 = vmatmul.msk.bf16.vlgmr.msrb.gmra.mxu2 %vm2357_vm4, %v1248_v5  ;;  %vm2361_vm4 = vmmov %vm2359_vm6 }
 0x6a5   : > { %v1302_v45 = vpop.f32.mrf.mxu3  ;;  %v1315_v12 = vpop.f32.mrf.mxu2 }
 0x6a6   : > { %v1303_v13 = vadd.f32 %v1302_v45, %v1257_v17  ;;  %v1316_v14 = vadd.f32 %v1315_v12, %v1257_v17 }
 0x6a8   : > { %v1321_v15 = vsel %vm539_vm3, %v1303_v13, 0.0  ;;  %v1322_v52 = vsel %vm539_vm3, %v1316_v14, 0.0  ;;  %v1326_v16 = vmul.f32 %v1303_v13, %v1303_v13  ;;  %v1327_v18 = vmul.f32 %v1316_v14, %v1316_v14 }
 0x6a9   : > { %v1323_v20 = vadd.f32 %v1322_v52, %v1321_v15 }
 0x6aa   : > { %v1328_v21 = vsel %vm539_vm3, %v1326_v16, 0.0  ;;  %v1329_v23 = vsel %vm539_vm3, %v1327_v18, 0.0 }
 0x6ab   : > { %1324 = vadd.xlane.f32.xlu0 %v1323_v20  ;;  %v1330_v48 = vadd.f32 %v1329_v23, %v1328_v21 }
 0x6ad   : > { %v1304_v24 = vpop.f32.mrf.mxu3  ;;  %v1317_v25 = vpop.f32.mrf.mxu2  ;;  %1331 = vadd.xlane.f32.xlu1 %v1330_v48  ;;  %v1440_v48 = vld [vmem:[%s2360_s25] sm:$0x3] }
 0x6bf   : > { %1446 = vperm.xlu0 %1716, %v1443_v58  }
 0x71e   : > { %v1325_v63 = vpop.xlane.xlu0 %1324 }
 0x720   : > { %v1332_v27 = vpop.xlane.xlu1 %1331 }
 0x721   : > { %v1333_v28 = vsel %vm2358_vm5, %v1325_v63, %v1332_v27  ;;  %vm2362_vm5 = vmmov %vm2361_vm4 }
 0x722   : > { %1626 = vmatpush.msk.msrb.mxu0 %vm539_vm3, %v1333_v28 }
 0x723   : > { %1627 = vmatmul.msk.f32.vlgmr.msrb.gmra.mxu0 %vm2359_vm6, %v2160_v41 }
 0x731   : > { %v1447_v25 = vpop.permute.xlu0 %1446 }
 0x7a0   : > { %v1354_v29 = vpop.f32.mrf.mxu0 }
 0x7a1   : > { %v1357_v32 = vmul.f32 %v1354_v29, %v1354_v29 }
 0x7a3   : > { %1359 = vrot.lane.b32.xlu2 %v1357_v32, %s1850_s23 }
 0x7ab   : > { %1382 = vrot.lane.b32.xlu2 %v1319_v33, %s1850_s23  ;;  %s1783_s23 = scalar_lea.hbm %s1782_s22, 8 }
 0x7ac   : > { %p1784_p6 = scmp.ne.s32.totalorder %s1782_s22, %s1783_s23  ;;  %p1789_p1 = scmp.lt.s32.totalorder %s1787_s19, %s1783_s23 }
 0x7ae   : > { %p1785_p9 = pnand %p1784_p6, %p1977_p11  ;;  %p1790_p3 = por %p1789_p1, %p1788_p0 }
 0x7b0   : > { %p1786_p13 = pneg %p1785_p9 }
 0x7b2   : > { %p1791_p4 = pnand %p1790_p3, %p1786_p13 }
 0x7b3   : > { %1376 = vperm.xlu2 %1713, %v1354_v29  }
 0x7bb   : > { %1714 = vset.pattern.permute.xlu2 %v1851_v49  ;;  %v1320_v49 = vld [vmem:[%s2317_s11] sm:$0xf] }
 0x7fd   : > { %v1360_v34 = vpop.permute.xlu2 %1359 }
 0x7fe   : > { %v1362_v54 = vsub.f32 %v1354_v29, %v1360_v34 }
 0x800   : > { %v1363_v35 = vadd.f32 1e-05, %v1362_v54 }
 0x802   : > { %1727 = vrsqrt.f32 %v1363_v35  ;;  %vm1370_vm10 = vweird.f32 %v1363_v35 }
 0x805   : > { %v1383_v43 = vpop.permute.xlu2 %1382 }
 0x808   : > { %v1728_v36 = vpop.eup %1727 }
 0x809   : > { %v1365_v10 = vmul.f32 %v1728_v36, %v1363_v35  ;;  %vm1371_vm7 = vweird.f32 %v1728_v36 }
 0x80a   : > { %vm1372_vm11 = vmor %vm1370_vm10, %vm1371_vm7 }
 0x80b   : > { %v1366_v41 = vmul.f32 %v1728_v36, %v1365_v10 }
 0x80d   : > { %v1367_v37 = vmul.f32 0.5, %v1366_v41  ;;  %v1377_v44 = vpop.permute.xlu2 %1376 }
 0x80e   : > { %v1379_v47 = vsub.f32 %v1303_v13, %v1377_v44  ;;  %v1380_v50 = vsub.f32 %v1316_v14, %v1377_v44 }
 0x80f   : > { %v1368_v38 = vsub.f32 1.5, %v1367_v37 }
 0x811   : > { %v1369_v39 = vmul.f32 %v1728_v36, %v1368_v38 }
 0x813   : > { %v1373_v40 = vsel %vm1372_vm11, %v1728_v36, %v1369_v39 }
 0x814   : > { %v1385_v22 = vmul.f32 %v1383_v43, %v1373_v40 }
 0x816   : > { %1388 = vperm.xlu2 %1714, %v1385_v22  }
 0x81e   : > { %1715 = vset.pattern.permute.xlu2 %v1835_v0 }
 0x81f   : > { %1395 = vperm.xlu2 %1715, %v1320_v49  }
 0x870   : > { %v1389_v46 = vpop.permute.xlu2 %1388 }
 0x871   : > { %v1391_v11 = vmul.f32 %v1389_v46, %v1379_v47  ;;  %v1392_v31 = vmul.f32 %v1389_v46, %v1380_v50 }
 0x879   : > { %v1396_v51 = vpop.permute.xlu2 %1395 }
 0x87a   : > { %v1398_v53 = vadd.f32 %v1396_v51, %v1391_v11  ;;  %v1399_v55 = vadd.f32 %v1396_v51, %v1392_v31 }
 0x87c   : > { %v1628_v26 = vmul.f32 -1.442695, %v1398_v53  ;;  %v1629_v56 = vmul.f32 -1.442695, %v1399_v55 }
 0x87e   : > { %1729 = vpow2.f32 %v1628_v26 }
 0x87f   : > { %1731 = vpow2.f32 %v1629_v56 }
 0x884   : > { %v1730_v0 = vpop.eup %1729 }
 0x885   : > { %v1732_v59 = vpop.eup %1731  ;;  %v1406_v62 = vadd.f32 1.0, %v1730_v0 }
 0x886   : > { %v1407_v1 = vadd.f32 1.0, %v1732_v59 }
 0x887   : > { %1733 = vrcp.f32 %v1406_v62  ;;  %v1419_v57 = vand.u32 2147483648, %v1406_v62  ;;  %v1417_v60 = vand.u32 2147483647, %v1406_v62  ;;  %vm1413_vm14 = vweird.f32 %v1406_v62 }
 0x888   : > { %1735 = vrcp.f32 %v1407_v1  ;;  %v1434_v61 = vand.u32 2147483648, %v1407_v1  ;;  %v1432_v19 = vand.u32 2147483647, %v1407_v1  ;;  %vm1428_vm9 = vweird.f32 %v1407_v1 }
 0x889   : > { %v1420_v5 = vor.u32 1.1754944e-38, %v1419_v57  ;;  %vm1418_vm15 = vcmp.eq.f32.partialorder %v1417_v60, 8.507059e+37 }
 0x88a   : > { %v1435_v12 = vor.u32 1.1754944e-38, %v1434_v61  ;;  %vm1433_vm1 = vcmp.eq.f32.partialorder %v1432_v19, 8.507059e+37 }
 0x88d   : > { %v1734_v30 = vpop.eup %1733 }
 0x88e   : > { %v1736_v2 = vpop.eup %1735  ;;  %v1409_v3 = vmul.f32 %v1734_v30, %v1406_v62  ;;  %vm1414_vm12 = vweird.f32 %v1734_v30 }
 0x88f   : > { %v1424_v4 = vmul.f32 %v1736_v2, %v1407_v1  ;;  %vm1429_vm13 = vweird.f32 %v1736_v2  ;;  %vm1415_vm8 = vmor %vm1413_vm14, %vm1414_vm12 }
 0x890   : > { %v1410_v42 = vsub.f32 1.0, %v1409_v3  ;;  %vm1430_vm0 = vmor %vm1428_vm9, %vm1429_vm13 }
 0x891   : > { %v1425_v6 = vsub.f32 1.0, %v1424_v4 }
 0x892   : > { %v1411_v7 = vmul.f32 %v1734_v30, %v1410_v42 }
 0x893   : > { %v1426_v8 = vmul.f32 %v1736_v2, %v1425_v6 }
 0x894   : > { %v1412_v9 = vadd.f32 %v1734_v30, %v1411_v7 }
 0x895   : > { %v1427_v17 = vadd.f32 %v1736_v2, %v1426_v8 }
 0x896   : > { %v1416_v45 = vsel %vm1415_vm8, %v1734_v30, %v1412_v9 }
 0x897   : > { %v1421_v13 = vsel %vm1418_vm15, %v1420_v5, %v1416_v45  ;;  %v1431_v14 = vsel %vm1430_vm0, %v1736_v2, %v1427_v17 }
 0x898   : > { %v1436_v15 = vsel %vm1433_vm1, %v1435_v12, %v1431_v14  ;;  %v1438_v52 = vmul.f32 %v1421_v13, %v1398_v53 }
 0x899   : > { %v1439_v16 = vmul.f32 %v1436_v15, %v1399_v55 }
 0x89a   : > { %v1441_v18 = vpack.c.bf16 %v1438_v52, %v1438_v52 }
 0x89b   : > { %v1442_v20 = vpack.c.bf16 %v1439_v16, %v1439_v16 }
 0x89c   : > { %v1453_v21 = vsel %vm504_vm2, %v1441_v18, 0 }
 0x89d   : > { %1465 = vmatpush.bf16.msrb.mxu1 %v1453_v21  ;;  %v1456_v23 = vsel %vm504_vm2, %v1442_v20, 0 }
 0x89e   : > { %1478 = vmatpush.bf16.msrb.mxu3 %v1456_v23 }
 0x8a0   : > { %1630 = vmatmul.msk.bf16.vlgmr.msrb.gmra.mxu1 %vm2361_vm4, %v1440_v48 }
 0x8a1   : > { %1631 = vmatmul.msk.bf16.vlgmr.msrb.gmra.mxu3 %vm2362_vm5, %v1440_v48 }
 0x91d   : > { %v1467_v24 = vpop.f32.mrf.mxu1 }
 0x91e   : > { %v1468_v29 = vadd.f32 %v1467_v24, %v1447_v25 }
 0x924   : > { %v1480_v63 = vpop.f32.mrf.mxu3 }
 0x925   : > { %v1481_v27 = vadd.f32 %v1480_v63, %v1447_v25  ;;  %v1469_v28 = vpop.f32.mrf.mxu1 }
 0x927   : > { %v1486_v32 = vrot.slane %v1481_v27, 4 }
 0x929   : > { %v1487_v33 = vsel %vm539_vm3, %v1468_v29, %v1486_v32 }
 0x92a   : > { %1489 = vst [vmem:[%s485_s15] sm:$0xff] %v1487_v33 }
 0x92b   : > { %1794 = shalt.err (!%p1791_p4)
}
 0x92c   : > { %1649 = dma.vmem_to_hbm [thread:$0]  (%p1977_p11), %s1505_s24, 128, %s1507_s18, %s1491_s17   ;;  %v1482_v34 = vpop.f32.mrf.mxu3 }
 0x92d PF: > { %s2366_s27 = sld [smem:[#allocation10_spill]]  ;;  %p2368_p7 = scmp.ge.s32.totalorder %s1833_s16, 2 }
 0x92f   : > { %p1656_p5 = pnand %p2368_p7, %p1981_p12 }
 0x931   : > { %p1657_p8 = pneg %p1656_p5 }
 0x933   : > { %s1518_s14 = sand.u32 1, %s2366_s27  }
 0x934   : > { %s1519_s15 = scalar_lea.sflag [#allocation6], %s1518_s14 }
 0x935   : > { %1816 = dma.done.wait (%p1657_p8), %s1519_s15, 128  }
 0x936   : > { %1818 = vsyncadd (%p1657_p8), %s1519_s15, 4294967168  ;;  %s2369_s16 = sld [smem:[#allocation12_spill]]  ;;  %s2372_s29 = smov %s1825_s30 }
 0x937   : > { %s2370_s22 = sld [smem:[#allocation11_spill]] }
 0x938   : > { %s2371_s15 = sld [smem:[#allocation13_spill]] }
 0x93c   : > { %p27_p10 = scmp.ge.s32.totalorder %s2369_s16, 4  }
 0x93d   : > { %s2373_s30 = smov %s2370_s22 }
 0x93e   :  { %29 = sbr.rel (!%p27_p10) target bundleno = 8 (0x8), region = 135 }
 0x943   :  { %1525 = vsyncpa [#allocation5], 1 }
 0x944   :  { %1527 = vsyncpa [#allocation5 + $0x1], 1 }
 0x945   :  { %1528 = vsyncpa [#allocation6], 1 }
 0x946   :  { %1530 = vsyncpa [#allocation6 + $0x1], 1 }

</bundles_post_ra>
